<compile_context>
chip_gen: v7x
topology: tpu7x:2x2x1
jax: 0.10.0
libtpu: 0.0.40
codegen_flags: <defaults>
</compile_context>

<pallas_src>
import functools
import math

import jax
import jax.numpy as jnp
from jax import lax
from jax.experimental import pallas as pl
from jax.experimental.pallas import tpu as pltpu


# Set to jnp.float32 if bit-level parity with the fp32 PyTorch reference is
# required; bfloat16 halves weight-streaming DMA bytes and uses the MXU's
# native bf16 path on v6e/v7x.
WEIGHT_DTYPE = jnp.bfloat16


# ----------------------------- fused encoder kernel -------------------------

def _encoder_kernel(emb_hbm_ref, mask_ref, eg_ref, eb_ref,
                    qkv_w_ref, qkv_b_ref, ao_w_ref, ao_b_ref,
                    ao_g_ref, ao_bb_ref, i_w_ref, i_b_ref,
                    o_w_ref, o_b_ref, o_g_ref, o_bb_ref,
                    cls_ref, hid_ref, *, B, S, nh, dh, eps):
    H = nh * dh
    f32 = jnp.float32

    def layernorm(x, g, b):
        mu = jnp.mean(x, axis=-1, keepdims=True)
        var = jnp.mean(jnp.square(x - mu), axis=-1, keepdims=True)
        return (x - mu) * lax.rsqrt(var + eps) * g + b

    def wdot(x, w_ref):
        # Cast the activation to the (bf16) weight dtype at the MXU input;
        # accumulate in f32. LayerNorm / softmax / GELU stay f32 throughout.
        return jnp.dot(x.astype(w_ref.dtype), w_ref[0],
                       preferred_element_type=f32)

    @pl.when(pl.program_id(0) == 0)
    def _():
        # Pull the summed embeddings from HBM once and apply the embedding
        # LayerNorm in place in the persistent hidden-state scratch.
        pltpu.sync_copy(emb_hbm_ref, hid_ref)
        hid_ref[...] = layernorm(hid_ref[...], eg_ref[...], eb_ref[...])

    hidden = hid_ref[...]                                        # (M, H) f32

    # ---- fused QKV projection (1/sqrt(dh) pre-folded into Q weights) ----
    qkv = wdot(hidden, qkv_w_ref) + qkv_b_ref[0]
    q = qkv[:, 0 * H:1 * H]
    k = qkv[:, 1 * H:2 * H]
    v = qkv[:, 2 * H:3 * H]
    mask = mask_ref[...]                                         # (B, S) additive

    # ---- multi-head self-attention; head contexts stay in registers ----
    ctx_rows = []
    for b in range(B):
        m_b = mask[b:b + 1, :]                                   # (1, S)
        r0 = b * S
        head_ctx = []
        for h in range(nh):
            c0 = h * dh
            qh = q[r0:r0 + S, c0:c0 + dh]
            kh = k[r0:r0 + S, c0:c0 + dh]
            vh = v[r0:r0 + S, c0:c0 + dh]
            # contract on dh of untransposed K (no materialized K^T)
            s = lax.dot_general(qh, kh, (((1,), (1,)), ((), ())),
                                preferred_element_type=f32) + m_b
            s = s - jnp.max(s, axis=-1, keepdims=True)
            p = jnp.exp(s)
            p = p / jnp.sum(p, axis=-1, keepdims=True)           # exact softmax
            head_ctx.append(jnp.dot(p, vh, preferred_element_type=f32))
        ctx_rows.append(jnp.concatenate(head_ctx, axis=1))       # (S, H)
    ctx = jnp.concatenate(ctx_rows, axis=0)                      # (M, H), in vregs

    # ---- attention output projection + residual LayerNorm ----
    attn = wdot(ctx, ao_w_ref) + ao_b_ref[0]
    hidden = layernorm(attn + hidden, ao_g_ref[0], ao_bb_ref[0])

    # ---- FFN: dense -> exact (erf) GELU -> dense, + residual LayerNorm ----
    inter = wdot(hidden, i_w_ref) + i_b_ref[0]
    inter = 0.5 * inter * (1.0 + lax.erf(inter * (1.0 / math.sqrt(2.0))))
    ffn = wdot(inter, o_w_ref) + o_b_ref[0]
    new_hidden = layernorm(ffn + hidden, o_g_ref[0], o_bb_ref[0])
    hid_ref[...] = new_hidden

    @pl.when(pl.program_id(0) == pl.num_programs(0) - 1)
    def _():
        # Emit only the CLS rows (row b*S per batch element), one dense store.
        cls_ref[...] = jnp.concatenate(
            [new_hidden[b * S:b * S + 1, :] for b in range(B)], axis=0)


def encoder_forward(emb2d, mask_add, packed, cfg):
    B, S = mask_add.shape
    H = cfg.hidden_size
    I = cfg.intermediate_size
    nh = cfg.num_attention_heads
    dh = H // nh
    L = cfg.num_hidden_layers
    M = B * S

    def full(shape):               # fetched once, resident across layers
        return pl.BlockSpec(shape, lambda l, _n=len(shape): (0,) * _n)

    def per_layer(shape):          # one layer's weights per grid step
        return pl.BlockSpec((1,) + shape,
                            lambda l, _n=len(shape): (l,) + (0,) * _n)

    in_specs = [
        pl.BlockSpec(memory_space=pl.ANY),   # summed embeddings, stay in HBM
        full((B, S)),              # additive attention mask
        full((1, H)),              # emb LN gamma
        full((1, H)),              # emb LN beta
        per_layer((H, 3 * H)),     # fused QKV weight (Q pre-scaled), bf16
        per_layer((1, 3 * H)),     # fused QKV bias (f32)
        per_layer((H, H)),         # attention output weight, bf16
        per_layer((1, H)),         # attention output bias
        per_layer((1, H)),         # attn LN gamma
        per_layer((1, H)),         # attn LN beta
        per_layer((H, I)),         # FFN intermediate weight, bf16
        per_layer((1, I)),         # FFN intermediate bias
        per_layer((I, H)),         # FFN output weight, bf16
        per_layer((1, H)),         # FFN output bias
        per_layer((1, H)),         # out LN gamma
        per_layer((1, H)),         # out LN beta
    ]

    return pl.pallas_call(
        functools.partial(_encoder_kernel, B=B, S=S, nh=nh, dh=dh,
                          eps=cfg.layer_norm_eps),
        grid_spec=pltpu.PrefetchScalarGridSpec(
            num_scalar_prefetch=0,
            grid=(L,),
            in_specs=in_specs,
            out_specs=pl.BlockSpec((B, H), lambda l: (0, 0)),   # CLS rows only
            scratch_shapes=[pltpu.VMEM((M, H), jnp.float32)],   # resident hidden
        ),
        out_shape=jax.ShapeDtypeStruct((B, H), jnp.float32),
        compiler_params=pltpu.CompilerParams(
            dimension_semantics=("arbitrary",)),
    )(emb2d, mask_add,
      packed["emb_ln_g"], packed["emb_ln_b"],
      packed["qkv_w"], packed["qkv_b"],
      packed["ao_w"], packed["ao_b"], packed["ao_ln_g"], packed["ao_ln_b"],
      packed["i_w"], packed["i_b"],
      packed["o_w"], packed["o_b"], packed["o_ln_g"], packed["o_ln_b"])


# ----------------------------- BERT (small) config ---------------------------

class Cfg:
    vocab_size = 100
    hidden_size = 32
    num_hidden_layers = 2
    num_attention_heads = 4
    intermediate_size = 64
    max_position_embeddings = 16
    type_vocab_size = 2
    layer_norm_eps = 1e-12


def init_params(key, cfg):
    def nrm(k, shape):
        return 0.02 * jax.random.normal(k, shape, dtype=jnp.float32)

    keys = jax.random.split(key, 3 + 8 * cfg.num_hidden_layers)
    H, I = cfg.hidden_size, cfg.intermediate_size
    params = {
        "word_emb": nrm(keys[0], (cfg.vocab_size, H)),
        "pos_emb": nrm(keys[1], (cfg.max_position_embeddings, H)),
        "type_emb": nrm(keys[2], (cfg.type_vocab_size, H)),
        "emb_ln_g": jnp.ones((H,), jnp.float32),
        "emb_ln_b": jnp.zeros((H,), jnp.float32),
        "layers": [],
    }
    ki = 3
    for _ in range(cfg.num_hidden_layers):
        lk = keys[ki:ki + 8]
        ki += 8
        params["layers"].append({
            "q_w": nrm(lk[0], (H, H)), "q_b": jnp.zeros((H,), jnp.float32),
            "k_w": nrm(lk[1], (H, H)), "k_b": jnp.zeros((H,), jnp.float32),
            "v_w": nrm(lk[2], (H, H)), "v_b": jnp.zeros((H,), jnp.float32),
            "ao_w": nrm(lk[3], (H, H)), "ao_b": jnp.zeros((H,), jnp.float32),
            "ao_ln_g": jnp.ones((H,), jnp.float32),
            "ao_ln_b": jnp.zeros((H,), jnp.float32),
            "i_w": nrm(lk[4], (H, I)), "i_b": jnp.zeros((I,), jnp.float32),
            "o_w": nrm(lk[5], (I, H)), "o_b": jnp.zeros((H,), jnp.float32),
            "o_ln_g": jnp.ones((H,), jnp.float32),
            "o_ln_b": jnp.zeros((H,), jnp.float32),
        })
    return params


def pack_params(params, cfg):
    """Stack per-layer weights (layer axis leading), fuse QKV, fold 1/sqrt(dh)
    into the Q projection, and cast the streamed matmul weights to
    WEIGHT_DTYPE (biases / LayerNorm params stay f32)."""
    H = cfg.hidden_size
    scale = 1.0 / math.sqrt(H // cfg.num_attention_heads)
    cols = {k: [] for k in ("qkv_w", "qkv_b", "ao_w", "ao_b", "ao_ln_g",
                            "ao_ln_b", "i_w", "i_b", "o_w", "o_b",
                            "o_ln_g", "o_ln_b")}
    for lyr in params["layers"]:
        cols["qkv_w"].append(jnp.concatenate(
            [lyr["q_w"] * scale, lyr["k_w"], lyr["v_w"]], axis=1))
        cols["qkv_b"].append(jnp.concatenate(
            [lyr["q_b"] * scale, lyr["k_b"], lyr["v_b"]], axis=0)[None, :])
        cols["ao_w"].append(lyr["ao_w"])
        cols["ao_b"].append(lyr["ao_b"][None, :])
        cols["ao_ln_g"].append(lyr["ao_ln_g"][None, :])
        cols["ao_ln_b"].append(lyr["ao_ln_b"][None, :])
        cols["i_w"].append(lyr["i_w"])
        cols["i_b"].append(lyr["i_b"][None, :])
        cols["o_w"].append(lyr["o_w"])
        cols["o_b"].append(lyr["o_b"][None, :])
        cols["o_ln_g"].append(lyr["o_ln_g"][None, :])
        cols["o_ln_b"].append(lyr["o_ln_b"][None, :])
    packed = {k: jnp.stack(v, axis=0) for k, v in cols.items()}
    for k in ("qkv_w", "ao_w", "i_w", "o_w"):
        packed[k] = packed[k].astype(WEIGHT_DTYPE)
    packed["emb_ln_g"] = params["emb_ln_g"][None, :]
    packed["emb_ln_b"] = params["emb_ln_b"][None, :]
    return packed


def bert_cls_forward(params, input_ids, attention_mask, token_type_ids, cfg):
    B, S = input_ids.shape
    H = cfg.hidden_size

    # Embedding table gathers are data-dependent row gathers; they stay in XLA.
    positions = jnp.arange(S, dtype=jnp.int32)[None, :]
    emb = (params["word_emb"][input_ids]
           + params["pos_emb"][positions]
           + params["type_emb"][token_type_ids]).astype(jnp.float32)
    emb2d = emb.reshape(B * S, H)
    mask_add = (1.0 - attention_mask.astype(jnp.float32)) * -1e9      # (B, S)

    packed = pack_params(params, cfg)
    return encoder_forward(emb2d, mask_add, packed, cfg)              # (B, H) CLS


# --------------------------------- main --------------------------------------

if __name__ == "__main__":
    cfg = Cfg()
    B, S = 2, 8

    key = jax.random.PRNGKey(0)
    pkey, ikey = jax.random.split(key)
    params = init_params(pkey, cfg)

    input_ids = jax.random.randint(ikey, (B, S), 0, cfg.vocab_size,
                                   dtype=jnp.int32)
    attention_mask = jnp.ones((B, S), dtype=jnp.int32)
    token_type_ids = jnp.zeros((B, S), dtype=jnp.int32)

    fwd = jax.jit(functools.partial(bert_cls_forward, cfg=cfg))
    out = fwd(params, input_ids, attention_mask, token_type_ids)
    out = jax.block_until_ready(out)
    assert out.shape == (B, cfg.hidden_size) and out.dtype == jnp.float32
    assert bool(jnp.all(jnp.isfinite(out)))
    print("KERNEL_OK")
</pallas_src>

<mosaic_0001>
module attributes {stable_mosaic.version = 11 : i64} {
  func.func @_encoder_kernel(%arg0: i32, %arg1: memref<16x32xf32, #tpu.memory_space<any>>, %arg2: memref<2x8xf32, #tpu.memory_space<vmem>>, %arg3: memref<1x32xf32, #tpu.memory_space<vmem>>, %arg4: memref<1x32xf32, #tpu.memory_space<vmem>>, %arg5: memref<1x32x96xbf16, #tpu.memory_space<vmem>>, %arg6: memref<1x1x96xf32, #tpu.memory_space<vmem>>, %arg7: memref<1x32x32xbf16, #tpu.memory_space<vmem>>, %arg8: memref<1x1x32xf32, #tpu.memory_space<vmem>>, %arg9: memref<1x1x32xf32, #tpu.memory_space<vmem>>, %arg10: memref<1x1x32xf32, #tpu.memory_space<vmem>>, %arg11: memref<1x32x64xbf16, #tpu.memory_space<vmem>>, %arg12: memref<1x1x64xf32, #tpu.memory_space<vmem>>, %arg13: memref<1x64x32xbf16, #tpu.memory_space<vmem>>, %arg14: memref<1x1x32xf32, #tpu.memory_space<vmem>>, %arg15: memref<1x1x32xf32, #tpu.memory_space<vmem>>, %arg16: memref<1x1x32xf32, #tpu.memory_space<vmem>>, %arg17: memref<2x32xf32, #tpu.memory_space<vmem>>, %arg18: memref<16x32xf32, #tpu.memory_space<vmem>>) attributes {dimension_semantics = [#tpu.dimension_semantics<arbitrary>], iteration_bounds = array<i64: 2>, scalar_prefetch = 0 : i64, scratch_operands = 1 : i64, tpu.core_type = #tpu.core_type<tc>, window_params = [{}, {pipeline_mode = #tpu.pipeline_mode<synchronous>, transform_indices = @transform_1, window_bounds = array<i64: 2, 8>}, {pipeline_mode = #tpu.pipeline_mode<synchronous>, transform_indices = @transform_2, window_bounds = array<i64: 1, 32>}, {pipeline_mode = #tpu.pipeline_mode<synchronous>, transform_indices = @transform_3, window_bounds = array<i64: 1, 32>}, {transform_indices = @transform_4, window_bounds = array<i64: 1, 32, 96>}, {transform_indices = @transform_5, window_bounds = array<i64: 1, 1, 96>}, {transform_indices = @transform_6, window_bounds = array<i64: 1, 32, 32>}, {transform_indices = @transform_7, window_bounds = array<i64: 1, 1, 32>}, {transform_indices = @transform_8, window_bounds = array<i64: 1, 1, 32>}, {transform_indices = @transform_9, window_bounds = array<i64: 1, 1, 32>}, {transform_indices = @transform_10, window_bounds = array<i64: 1, 32, 64>}, {transform_indices = @transform_11, window_bounds = array<i64: 1, 1, 64>}, {transform_indices = @transform_12, window_bounds = array<i64: 1, 64, 32>}, {transform_indices = @transform_13, window_bounds = array<i64: 1, 1, 32>}, {transform_indices = @transform_14, window_bounds = array<i64: 1, 1, 32>}, {transform_indices = @transform_15, window_bounds = array<i64: 1, 1, 32>}, {pipeline_mode = #tpu.pipeline_mode<synchronous>, transform_indices = @transform_16, window_bounds = array<i64: 2, 32>}]} {
    %c0_i32 = arith.constant 0 : i32
    %0 = arith.cmpi eq, %arg0, %c0_i32 : i32
    %1 = arith.extui %0 : i1 to i32
    %c0_i32_0 = arith.constant 0 : i32
    %2 = arith.cmpi ne, %1, %c0_i32_0 : i32
    scf.if %2 {
      "tpu.region"() ({
        %265 = tpu.sem_alloc : memref<!tpu.dma_semaphore, #tpu.memory_space<semaphore_mem>>
        tpu.enqueue_dma source(%arg1 : memref<16x32xf32, #tpu.memory_space<any>>) target(%arg18 : memref<16x32xf32, #tpu.memory_space<vmem>>) target_semaphore(%265 : memref<!tpu.dma_semaphore, #tpu.memory_space<semaphore_mem>>)
        tpu.wait_dma2 semaphore(%265 : memref<!tpu.dma_semaphore, #tpu.memory_space<semaphore_mem>>) src(%arg1 : memref<16x32xf32, #tpu.memory_space<any>>) dst(%arg18 : memref<16x32xf32, #tpu.memory_space<vmem>>)
        tpu.yield
      }) : () -> ()
      %c0_91 = arith.constant 0 : index
      %c0_92 = arith.constant 0 : index
      %239 = vector.load %arg18[%c0_91, %c0_92] : memref<16x32xf32, #tpu.memory_space<vmem>>, vector<16x32xf32>
      %c0_93 = arith.constant 0 : index
      %c0_94 = arith.constant 0 : index
      %240 = vector.load %arg3[%c0_93, %c0_94] : memref<1x32xf32, #tpu.memory_space<vmem>>, vector<1x32xf32>
      %c0_95 = arith.constant 0 : index
      %c0_96 = arith.constant 0 : index
      %241 = vector.load %arg4[%c0_95, %c0_96] : memref<1x32xf32, #tpu.memory_space<vmem>>, vector<1x32xf32>
      %cst_97 = arith.constant dense<0.000000e+00> : vector<16xf32>
      %242 = vector.multi_reduction <add>, %239, %cst_97 [1] : vector<16x32xf32> to vector<16xf32>
      %243 = vector.shape_cast %242 : vector<16xf32> to vector<16x1xf32>
      %cst_98 = arith.constant 3.200000e+01 : f32
      %244 = vector.broadcast %cst_98 : f32 to vector<16x1xf32>
      %245 = arith.divf %243, %244 : vector<16x1xf32>
      %246 = vector.broadcast %245 : vector<16x1xf32> to vector<16x32xf32>
      %247 = arith.subf %239, %246 : vector<16x32xf32>
      %248 = arith.mulf %247, %247 : vector<16x32xf32>
      %cst_99 = arith.constant dense<0.000000e+00> : vector<16xf32>
      %249 = vector.multi_reduction <add>, %248, %cst_99 [1] : vector<16x32xf32> to vector<16xf32>
      %250 = vector.shape_cast %249 : vector<16xf32> to vector<16x1xf32>
      %cst_100 = arith.constant 3.200000e+01 : f32
      %251 = vector.broadcast %cst_100 : f32 to vector<16x1xf32>
      %252 = arith.divf %250, %251 : vector<16x1xf32>
      %253 = vector.broadcast %245 : vector<16x1xf32> to vector<16x32xf32>
      %254 = arith.subf %239, %253 : vector<16x32xf32>
      %cst_101 = arith.constant 9.99999996E-13 : f32
      %255 = vector.broadcast %cst_101 : f32 to vector<16x1xf32>
      %256 = arith.addf %252, %255 : vector<16x1xf32>
      %257 = math.rsqrt %256 : vector<16x1xf32>
      %258 = vector.broadcast %257 : vector<16x1xf32> to vector<16x32xf32>
      %259 = arith.mulf %254, %258 : vector<16x32xf32>
      %260 = vector.broadcast %240 : vector<1x32xf32> to vector<16x32xf32>
      %261 = arith.mulf %259, %260 : vector<16x32xf32>
      %262 = vector.broadcast %241 : vector<1x32xf32> to vector<16x32xf32>
      %263 = arith.addf %261, %262 : vector<16x32xf32>
      %c0_102 = arith.constant 0 : index
      %c0_103 = arith.constant 0 : index
      %264 = vector.load %arg18[%c0_102, %c0_103] : memref<16x32xf32, #tpu.memory_space<vmem>>, vector<16x32xf32>
      tpu.vector_store %arg18[%c0_102, %c0_103], %263 {strides = array<i32>} : memref<16x32xf32, #tpu.memory_space<vmem>>, vector<16x32xf32>,
    } else {
    }
    %c0 = arith.constant 0 : index
    %c0_1 = arith.constant 0 : index
    %3 = vector.load %arg18[%c0, %c0_1] : memref<16x32xf32, #tpu.memory_space<vmem>>, vector<16x32xf32>
    %4 = arith.truncf %3 : vector<16x32xf32> to vector<16x32xbf16>
    %c0_2 = arith.constant 0 : index
    %c0_3 = arith.constant 0 : index
    %c0_4 = arith.constant 0 : index
    %5 = vector.load %arg5[%c0_2, %c0_3, %c0_4] : memref<1x32x96xbf16, #tpu.memory_space<vmem>>, vector<1x32x96xbf16>
    %6 = vector.shape_cast %5 : vector<1x32x96xbf16> to vector<32x96xbf16>
    %cst = arith.constant dense<0.000000e+00> : vector<16x96xf32>
    %7 = tpu.matmul %4, %6, %cst {dimension_numbers = #tpu.dot_dimension_numbers<[1], [0], [0], [1], [0, 0, 1, 1], [], []>} : vector<16x32xbf16>, vector<32x96xbf16>, vector<16x96xf32> -> vector<16x96xf32>
    %c0_5 = arith.constant 0 : index
    %c0_6 = arith.constant 0 : index
    %c0_7 = arith.constant 0 : index
    %8 = vector.load %arg6[%c0_5, %c0_6, %c0_7] : memref<1x1x96xf32, #tpu.memory_space<vmem>>, vector<1x1x96xf32>
    %9 = vector.shape_cast %8 : vector<1x1x96xf32> to vector<1x96xf32>
    %10 = vector.broadcast %9 : vector<1x96xf32> to vector<16x96xf32>
    %11 = arith.addf %7, %10 : vector<16x96xf32>
    %12 = vector.extract_strided_slice %11 {offsets = [0, 0], sizes = [16, 32], strides = [1, 1]} : vector<16x96xf32> to vector<16x32xf32>
    %13 = vector.extract_strided_slice %11 {offsets = [0, 32], sizes = [16, 32], strides = [1, 1]} : vector<16x96xf32> to vector<16x32xf32>
    %14 = vector.extract_strided_slice %11 {offsets = [0, 64], sizes = [16, 32], strides = [1, 1]} : vector<16x96xf32> to vector<16x32xf32>
    %c0_8 = arith.constant 0 : index
    %c0_9 = arith.constant 0 : index
    %15 = vector.load %arg2[%c0_8, %c0_9] : memref<2x8xf32, #tpu.memory_space<vmem>>, vector<2x8xf32>
    %16 = vector.extract_strided_slice %15 {offsets = [0, 0], sizes = [1, 8], strides = [1, 1]} : vector<2x8xf32> to vector<1x8xf32>
    %17 = vector.extract_strided_slice %12 {offsets = [0, 0], sizes = [8, 8], strides = [1, 1]} : vector<16x32xf32> to vector<8x8xf32>
    %18 = vector.extract_strided_slice %13 {offsets = [0, 0], sizes = [8, 8], strides = [1, 1]} : vector<16x32xf32> to vector<8x8xf32>
    %19 = vector.extract_strided_slice %14 {offsets = [0, 0], sizes = [8, 8], strides = [1, 1]} : vector<16x32xf32> to vector<8x8xf32>
    %cst_10 = arith.constant dense<0.000000e+00> : vector<8x8xf32>
    %20 = tpu.matmul %17, %18, %cst_10 {dimension_numbers = #tpu.dot_dimension_numbers<[1], [1], [0], [0], [0, 0, 1, 0], [], []>} : vector<8x8xf32>, vector<8x8xf32>, vector<8x8xf32> -> vector<8x8xf32>
    %21 = vector.broadcast %16 : vector<1x8xf32> to vector<8x8xf32>
    %22 = arith.addf %20, %21 : vector<8x8xf32>
    %cst_11 = arith.constant dense<0xFF800000> : vector<8xf32>
    %23 = vector.multi_reduction <maximumf>, %22, %cst_11 [1] : vector<8x8xf32> to vector<8xf32>
    %24 = vector.shape_cast %23 : vector<8xf32> to vector<8x1xf32>
    %25 = vector.broadcast %24 : vector<8x1xf32> to vector<8x8xf32>
    %26 = arith.subf %22, %25 : vector<8x8xf32>
    %27 = math.exp %26 : vector<8x8xf32>
    %cst_12 = arith.constant dense<0.000000e+00> : vector<8xf32>
    %28 = vector.multi_reduction <add>, %27, %cst_12 [1] : vector<8x8xf32> to vector<8xf32>
    %29 = vector.shape_cast %28 : vector<8xf32> to vector<8x1xf32>
    %30 = vector.broadcast %29 : vector<8x1xf32> to vector<8x8xf32>
    %31 = arith.divf %27, %30 : vector<8x8xf32>
    %cst_13 = arith.constant dense<0.000000e+00> : vector<8x8xf32>
    %32 = tpu.matmul %31, %19, %cst_13 {dimension_numbers = #tpu.dot_dimension_numbers<[1], [0], [0], [1], [0, 0, 1, 1], [], []>} : vector<8x8xf32>, vector<8x8xf32>, vector<8x8xf32> -> vector<8x8xf32>
    %33 = vector.extract_strided_slice %12 {offsets = [0, 8], sizes = [8, 8], strides = [1, 1]} : vector<16x32xf32> to vector<8x8xf32>
    %34 = vector.extract_strided_slice %13 {offsets = [0, 8], sizes = [8, 8], strides = [1, 1]} : vector<16x32xf32> to vector<8x8xf32>
    %35 = vector.extract_strided_slice %14 {offsets = [0, 8], sizes = [8, 8], strides = [1, 1]} : vector<16x32xf32> to vector<8x8xf32>
    %cst_14 = arith.constant dense<0.000000e+00> : vector<8x8xf32>
    %36 = tpu.matmul %33, %34, %cst_14 {dimension_numbers = #tpu.dot_dimension_numbers<[1], [1], [0], [0], [0, 0, 1, 0], [], []>} : vector<8x8xf32>, vector<8x8xf32>, vector<8x8xf32> -> vector<8x8xf32>
    %37 = vector.broadcast %16 : vector<1x8xf32> to vector<8x8xf32>
    %38 = arith.addf %36, %37 : vector<8x8xf32>
    %cst_15 = arith.constant dense<0xFF800000> : vector<8xf32>
    %39 = vector.multi_reduction <maximumf>, %38, %cst_15 [1] : vector<8x8xf32> to vector<8xf32>
    %40 = vector.shape_cast %39 : vector<8xf32> to vector<8x1xf32>
    %41 = vector.broadcast %40 : vector<8x1xf32> to vector<8x8xf32>
    %42 = arith.subf %38, %41 : vector<8x8xf32>
    %43 = math.exp %42 : vector<8x8xf32>
    %cst_16 = arith.constant dense<0.000000e+00> : vector<8xf32>
    %44 = vector.multi_reduction <add>, %43, %cst_16 [1] : vector<8x8xf32> to vector<8xf32>
    %45 = vector.shape_cast %44 : vector<8xf32> to vector<8x1xf32>
    %46 = vector.broadcast %45 : vector<8x1xf32> to vector<8x8xf32>
    %47 = arith.divf %43, %46 : vector<8x8xf32>
    %cst_17 = arith.constant dense<0.000000e+00> : vector<8x8xf32>
    %48 = tpu.matmul %47, %35, %cst_17 {dimension_numbers = #tpu.dot_dimension_numbers<[1], [0], [0], [1], [0, 0, 1, 1], [], []>} : vector<8x8xf32>, vector<8x8xf32>, vector<8x8xf32> -> vector<8x8xf32>
    %49 = vector.extract_strided_slice %12 {offsets = [0, 16], sizes = [8, 8], strides = [1, 1]} : vector<16x32xf32> to vector<8x8xf32>
    %50 = vector.extract_strided_slice %13 {offsets = [0, 16], sizes = [8, 8], strides = [1, 1]} : vector<16x32xf32> to vector<8x8xf32>
    %51 = vector.extract_strided_slice %14 {offsets = [0, 16], sizes = [8, 8], strides = [1, 1]} : vector<16x32xf32> to vector<8x8xf32>
    %cst_18 = arith.constant dense<0.000000e+00> : vector<8x8xf32>
    %52 = tpu.matmul %49, %50, %cst_18 {dimension_numbers = #tpu.dot_dimension_numbers<[1], [1], [0], [0], [0, 0, 1, 0], [], []>} : vector<8x8xf32>, vector<8x8xf32>, vector<8x8xf32> -> vector<8x8xf32>
    %53 = vector.broadcast %16 : vector<1x8xf32> to vector<8x8xf32>
    %54 = arith.addf %52, %53 : vector<8x8xf32>
    %cst_19 = arith.constant dense<0xFF800000> : vector<8xf32>
    %55 = vector.multi_reduction <maximumf>, %54, %cst_19 [1] : vector<8x8xf32> to vector<8xf32>
    %56 = vector.shape_cast %55 : vector<8xf32> to vector<8x1xf32>
    %57 = vector.broadcast %56 : vector<8x1xf32> to vector<8x8xf32>
    %58 = arith.subf %54, %57 : vector<8x8xf32>
    %59 = math.exp %58 : vector<8x8xf32>
    %cst_20 = arith.constant dense<0.000000e+00> : vector<8xf32>
    %60 = vector.multi_reduction <add>, %59, %cst_20 [1] : vector<8x8xf32> to vector<8xf32>
    %61 = vector.shape_cast %60 : vector<8xf32> to vector<8x1xf32>
    %62 = vector.broadcast %61 : vector<8x1xf32> to vector<8x8xf32>
    %63 = arith.divf %59, %62 : vector<8x8xf32>
    %cst_21 = arith.constant dense<0.000000e+00> : vector<8x8xf32>
    %64 = tpu.matmul %63, %51, %cst_21 {dimension_numbers = #tpu.dot_dimension_numbers<[1], [0], [0], [1], [0, 0, 1, 1], [], []>} : vector<8x8xf32>, vector<8x8xf32>, vector<8x8xf32> -> vector<8x8xf32>
    %65 = vector.extract_strided_slice %12 {offsets = [0, 24], sizes = [8, 8], strides = [1, 1]} : vector<16x32xf32> to vector<8x8xf32>
    %66 = vector.extract_strided_slice %13 {offsets = [0, 24], sizes = [8, 8], strides = [1, 1]} : vector<16x32xf32> to vector<8x8xf32>
    %67 = vector.extract_strided_slice %14 {offsets = [0, 24], sizes = [8, 8], strides = [1, 1]} : vector<16x32xf32> to vector<8x8xf32>
    %cst_22 = arith.constant dense<0.000000e+00> : vector<8x8xf32>
    %68 = tpu.matmul %65, %66, %cst_22 {dimension_numbers = #tpu.dot_dimension_numbers<[1], [1], [0], [0], [0, 0, 1, 0], [], []>} : vector<8x8xf32>, vector<8x8xf32>, vector<8x8xf32> -> vector<8x8xf32>
    %69 = vector.broadcast %16 : vector<1x8xf32> to vector<8x8xf32>
    %70 = arith.addf %68, %69 : vector<8x8xf32>
    %cst_23 = arith.constant dense<0xFF800000> : vector<8xf32>
    %71 = vector.multi_reduction <maximumf>, %70, %cst_23 [1] : vector<8x8xf32> to vector<8xf32>
    %72 = vector.shape_cast %71 : vector<8xf32> to vector<8x1xf32>
    %73 = vector.broadcast %72 : vector<8x1xf32> to vector<8x8xf32>
    %74 = arith.subf %70, %73 : vector<8x8xf32>
    %75 = math.exp %74 : vector<8x8xf32>
    %cst_24 = arith.constant dense<0.000000e+00> : vector<8xf32>
    %76 = vector.multi_reduction <add>, %75, %cst_24 [1] : vector<8x8xf32> to vector<8xf32>
    %77 = vector.shape_cast %76 : vector<8xf32> to vector<8x1xf32>
    %78 = vector.broadcast %77 : vector<8x1xf32> to vector<8x8xf32>
    %79 = arith.divf %75, %78 : vector<8x8xf32>
    %cst_25 = arith.constant dense<0.000000e+00> : vector<8x8xf32>
    %80 = tpu.matmul %79, %67, %cst_25 {dimension_numbers = #tpu.dot_dimension_numbers<[1], [0], [0], [1], [0, 0, 1, 1], [], []>} : vector<8x8xf32>, vector<8x8xf32>, vector<8x8xf32> -> vector<8x8xf32>
    %81 = tpu.concatenate %32, %48, %64, %80 in 1 : vector<8x8xf32>, vector<8x8xf32>, vector<8x8xf32>, vector<8x8xf32> -> vector<8x32xf32>
    %82 = vector.extract_strided_slice %15 {offsets = [1, 0], sizes = [1, 8], strides = [1, 1]} : vector<2x8xf32> to vector<1x8xf32>
    %83 = vector.extract_strided_slice %12 {offsets = [8, 0], sizes = [8, 8], strides = [1, 1]} : vector<16x32xf32> to vector<8x8xf32>
    %84 = vector.extract_strided_slice %13 {offsets = [8, 0], sizes = [8, 8], strides = [1, 1]} : vector<16x32xf32> to vector<8x8xf32>
    %85 = vector.extract_strided_slice %14 {offsets = [8, 0], sizes = [8, 8], strides = [1, 1]} : vector<16x32xf32> to vector<8x8xf32>
    %cst_26 = arith.constant dense<0.000000e+00> : vector<8x8xf32>
    %86 = tpu.matmul %83, %84, %cst_26 {dimension_numbers = #tpu.dot_dimension_numbers<[1], [1], [0], [0], [0, 0, 1, 0], [], []>} : vector<8x8xf32>, vector<8x8xf32>, vector<8x8xf32> -> vector<8x8xf32>
    %87 = vector.broadcast %82 : vector<1x8xf32> to vector<8x8xf32>
    %88 = arith.addf %86, %87 : vector<8x8xf32>
    %cst_27 = arith.constant dense<0xFF800000> : vector<8xf32>
    %89 = vector.multi_reduction <maximumf>, %88, %cst_27 [1] : vector<8x8xf32> to vector<8xf32>
    %90 = vector.shape_cast %89 : vector<8xf32> to vector<8x1xf32>
    %91 = vector.broadcast %90 : vector<8x1xf32> to vector<8x8xf32>
    %92 = arith.subf %88, %91 : vector<8x8xf32>
    %93 = math.exp %92 : vector<8x8xf32>
    %cst_28 = arith.constant dense<0.000000e+00> : vector<8xf32>
    %94 = vector.multi_reduction <add>, %93, %cst_28 [1] : vector<8x8xf32> to vector<8xf32>
    %95 = vector.shape_cast %94 : vector<8xf32> to vector<8x1xf32>
    %96 = vector.broadcast %95 : vector<8x1xf32> to vector<8x8xf32>
    %97 = arith.divf %93, %96 : vector<8x8xf32>
    %cst_29 = arith.constant dense<0.000000e+00> : vector<8x8xf32>
    %98 = tpu.matmul %97, %85, %cst_29 {dimension_numbers = #tpu.dot_dimension_numbers<[1], [0], [0], [1], [0, 0, 1, 1], [], []>} : vector<8x8xf32>, vector<8x8xf32>, vector<8x8xf32> -> vector<8x8xf32>
    %99 = vector.extract_strided_slice %12 {offsets = [8, 8], sizes = [8, 8], strides = [1, 1]} : vector<16x32xf32> to vector<8x8xf32>
    %100 = vector.extract_strided_slice %13 {offsets = [8, 8], sizes = [8, 8], strides = [1, 1]} : vector<16x32xf32> to vector<8x8xf32>
    %101 = vector.extract_strided_slice %14 {offsets = [8, 8], sizes = [8, 8], strides = [1, 1]} : vector<16x32xf32> to vector<8x8xf32>
    %cst_30 = arith.constant dense<0.000000e+00> : vector<8x8xf32>
    %102 = tpu.matmul %99, %100, %cst_30 {dimension_numbers = #tpu.dot_dimension_numbers<[1], [1], [0], [0], [0, 0, 1, 0], [], []>} : vector<8x8xf32>, vector<8x8xf32>, vector<8x8xf32> -> vector<8x8xf32>
    %103 = vector.broadcast %82 : vector<1x8xf32> to vector<8x8xf32>
    %104 = arith.addf %102, %103 : vector<8x8xf32>
    %cst_31 = arith.constant dense<0xFF800000> : vector<8xf32>
    %105 = vector.multi_reduction <maximumf>, %104, %cst_31 [1] : vector<8x8xf32> to vector<8xf32>
    %106 = vector.shape_cast %105 : vector<8xf32> to vector<8x1xf32>
    %107 = vector.broadcast %106 : vector<8x1xf32> to vector<8x8xf32>
    %108 = arith.subf %104, %107 : vector<8x8xf32>
    %109 = math.exp %108 : vector<8x8xf32>
    %cst_32 = arith.constant dense<0.000000e+00> : vector<8xf32>
    %110 = vector.multi_reduction <add>, %109, %cst_32 [1] : vector<8x8xf32> to vector<8xf32>
    %111 = vector.shape_cast %110 : vector<8xf32> to vector<8x1xf32>
    %112 = vector.broadcast %111 : vector<8x1xf32> to vector<8x8xf32>
    %113 = arith.divf %109, %112 : vector<8x8xf32>
    %cst_33 = arith.constant dense<0.000000e+00> : vector<8x8xf32>
    %114 = tpu.matmul %113, %101, %cst_33 {dimension_numbers = #tpu.dot_dimension_numbers<[1], [0], [0], [1], [0, 0, 1, 1], [], []>} : vector<8x8xf32>, vector<8x8xf32>, vector<8x8xf32> -> vector<8x8xf32>
    %115 = vector.extract_strided_slice %12 {offsets = [8, 16], sizes = [8, 8], strides = [1, 1]} : vector<16x32xf32> to vector<8x8xf32>
    %116 = vector.extract_strided_slice %13 {offsets = [8, 16], sizes = [8, 8], strides = [1, 1]} : vector<16x32xf32> to vector<8x8xf32>
    %117 = vector.extract_strided_slice %14 {offsets = [8, 16], sizes = [8, 8], strides = [1, 1]} : vector<16x32xf32> to vector<8x8xf32>
    %cst_34 = arith.constant dense<0.000000e+00> : vector<8x8xf32>
    %118 = tpu.matmul %115, %116, %cst_34 {dimension_numbers = #tpu.dot_dimension_numbers<[1], [1], [0], [0], [0, 0, 1, 0], [], []>} : vector<8x8xf32>, vector<8x8xf32>, vector<8x8xf32> -> vector<8x8xf32>
    %119 = vector.broadcast %82 : vector<1x8xf32> to vector<8x8xf32>
    %120 = arith.addf %118, %119 : vector<8x8xf32>
    %cst_35 = arith.constant dense<0xFF800000> : vector<8xf32>
    %121 = vector.multi_reduction <maximumf>, %120, %cst_35 [1] : vector<8x8xf32> to vector<8xf32>
    %122 = vector.shape_cast %121 : vector<8xf32> to vector<8x1xf32>
    %123 = vector.broadcast %122 : vector<8x1xf32> to vector<8x8xf32>
    %124 = arith.subf %120, %123 : vector<8x8xf32>
    %125 = math.exp %124 : vector<8x8xf32>
    %cst_36 = arith.constant dense<0.000000e+00> : vector<8xf32>
    %126 = vector.multi_reduction <add>, %125, %cst_36 [1] : vector<8x8xf32> to vector<8xf32>
    %127 = vector.shape_cast %126 : vector<8xf32> to vector<8x1xf32>
    %128 = vector.broadcast %127 : vector<8x1xf32> to vector<8x8xf32>
    %129 = arith.divf %125, %128 : vector<8x8xf32>
    %cst_37 = arith.constant dense<0.000000e+00> : vector<8x8xf32>
    %130 = tpu.matmul %129, %117, %cst_37 {dimension_numbers = #tpu.dot_dimension_numbers<[1], [0], [0], [1], [0, 0, 1, 1], [], []>} : vector<8x8xf32>, vector<8x8xf32>, vector<8x8xf32> -> vector<8x8xf32>
    %131 = vector.extract_strided_slice %12 {offsets = [8, 24], sizes = [8, 8], strides = [1, 1]} : vector<16x32xf32> to vector<8x8xf32>
    %132 = vector.extract_strided_slice %13 {offsets = [8, 24], sizes = [8, 8], strides = [1, 1]} : vector<16x32xf32> to vector<8x8xf32>
    %133 = vector.extract_strided_slice %14 {offsets = [8, 24], sizes = [8, 8], strides = [1, 1]} : vector<16x32xf32> to vector<8x8xf32>
    %cst_38 = arith.constant dense<0.000000e+00> : vector<8x8xf32>
    %134 = tpu.matmul %131, %132, %cst_38 {dimension_numbers = #tpu.dot_dimension_numbers<[1], [1], [0], [0], [0, 0, 1, 0], [], []>} : vector<8x8xf32>, vector<8x8xf32>, vector<8x8xf32> -> vector<8x8xf32>
    %135 = vector.broadcast %82 : vector<1x8xf32> to vector<8x8xf32>
    %136 = arith.addf %134, %135 : vector<8x8xf32>
    %cst_39 = arith.constant dense<0xFF800000> : vector<8xf32>
    %137 = vector.multi_reduction <maximumf>, %136, %cst_39 [1] : vector<8x8xf32> to vector<8xf32>
    %138 = vector.shape_cast %137 : vector<8xf32> to vector<8x1xf32>
    %139 = vector.broadcast %138 : vector<8x1xf32> to vector<8x8xf32>
    %140 = arith.subf %136, %139 : vector<8x8xf32>
    %141 = math.exp %140 : vector<8x8xf32>
    %cst_40 = arith.constant dense<0.000000e+00> : vector<8xf32>
    %142 = vector.multi_reduction <add>, %141, %cst_40 [1] : vector<8x8xf32> to vector<8xf32>
    %143 = vector.shape_cast %142 : vector<8xf32> to vector<8x1xf32>
    %144 = vector.broadcast %143 : vector<8x1xf32> to vector<8x8xf32>
    %145 = arith.divf %141, %144 : vector<8x8xf32>
    %cst_41 = arith.constant dense<0.000000e+00> : vector<8x8xf32>
    %146 = tpu.matmul %145, %133, %cst_41 {dimension_numbers = #tpu.dot_dimension_numbers<[1], [0], [0], [1], [0, 0, 1, 1], [], []>} : vector<8x8xf32>, vector<8x8xf32>, vector<8x8xf32> -> vector<8x8xf32>
    %147 = tpu.concatenate %98, %114, %130, %146 in 1 : vector<8x8xf32>, vector<8x8xf32>, vector<8x8xf32>, vector<8x8xf32> -> vector<8x32xf32>
    %148 = tpu.concatenate %81, %147 in 0 : vector<8x32xf32>, vector<8x32xf32> -> vector<16x32xf32>
    %149 = arith.truncf %148 : vector<16x32xf32> to vector<16x32xbf16>
    %c0_42 = arith.constant 0 : index
    %c0_43 = arith.constant 0 : index
    %c0_44 = arith.constant 0 : index
    %150 = vector.load %arg7[%c0_42, %c0_43, %c0_44] : memref<1x32x32xbf16, #tpu.memory_space<vmem>>, vector<1x32x32xbf16>
    %151 = vector.shape_cast %150 : vector<1x32x32xbf16> to vector<32x32xbf16>
    %cst_45 = arith.constant dense<0.000000e+00> : vector<16x32xf32>
    %152 = tpu.matmul %149, %151, %cst_45 {dimension_numbers = #tpu.dot_dimension_numbers<[1], [0], [0], [1], [0, 0, 1, 1], [], []>} : vector<16x32xbf16>, vector<32x32xbf16>, vector<16x32xf32> -> vector<16x32xf32>
    %c0_46 = arith.constant 0 : index
    %c0_47 = arith.constant 0 : index
    %c0_48 = arith.constant 0 : index
    %153 = vector.load %arg8[%c0_46, %c0_47, %c0_48] : memref<1x1x32xf32, #tpu.memory_space<vmem>>, vector<1x1x32xf32>
    %154 = vector.shape_cast %153 : vector<1x1x32xf32> to vector<1x32xf32>
    %155 = vector.broadcast %154 : vector<1x32xf32> to vector<16x32xf32>
    %156 = arith.addf %152, %155 : vector<16x32xf32>
    %157 = arith.addf %156, %3 : vector<16x32xf32>
    %c0_49 = arith.constant 0 : index
    %c0_50 = arith.constant 0 : index
    %c0_51 = arith.constant 0 : index
    %158 = vector.load %arg9[%c0_49, %c0_50, %c0_51] : memref<1x1x32xf32, #tpu.memory_space<vmem>>, vector<1x1x32xf32>
    %159 = vector.shape_cast %158 : vector<1x1x32xf32> to vector<1x32xf32>
    %c0_52 = arith.constant 0 : index
    %c0_53 = arith.constant 0 : index
    %c0_54 = arith.constant 0 : index
    %160 = vector.load %arg10[%c0_52, %c0_53, %c0_54] : memref<1x1x32xf32, #tpu.memory_space<vmem>>, vector<1x1x32xf32>
    %161 = vector.shape_cast %160 : vector<1x1x32xf32> to vector<1x32xf32>
    %cst_55 = arith.constant dense<0.000000e+00> : vector<16xf32>
    %162 = vector.multi_reduction <add>, %157, %cst_55 [1] : vector<16x32xf32> to vector<16xf32>
    %163 = vector.shape_cast %162 : vector<16xf32> to vector<16x1xf32>
    %cst_56 = arith.constant 3.200000e+01 : f32
    %164 = vector.broadcast %cst_56 : f32 to vector<16x1xf32>
    %165 = arith.divf %163, %164 : vector<16x1xf32>
    %166 = vector.broadcast %165 : vector<16x1xf32> to vector<16x32xf32>
    %167 = arith.subf %157, %166 : vector<16x32xf32>
    %168 = arith.mulf %167, %167 : vector<16x32xf32>
    %cst_57 = arith.constant dense<0.000000e+00> : vector<16xf32>
    %169 = vector.multi_reduction <add>, %168, %cst_57 [1] : vector<16x32xf32> to vector<16xf32>
    %170 = vector.shape_cast %169 : vector<16xf32> to vector<16x1xf32>
    %cst_58 = arith.constant 3.200000e+01 : f32
    %171 = vector.broadcast %cst_58 : f32 to vector<16x1xf32>
    %172 = arith.divf %170, %171 : vector<16x1xf32>
    %173 = vector.broadcast %165 : vector<16x1xf32> to vector<16x32xf32>
    %174 = arith.subf %157, %173 : vector<16x32xf32>
    %cst_59 = arith.constant 9.99999996E-13 : f32
    %175 = vector.broadcast %cst_59 : f32 to vector<16x1xf32>
    %176 = arith.addf %172, %175 : vector<16x1xf32>
    %177 = math.rsqrt %176 : vector<16x1xf32>
    %178 = vector.broadcast %177 : vector<16x1xf32> to vector<16x32xf32>
    %179 = arith.mulf %174, %178 : vector<16x32xf32>
    %180 = vector.broadcast %159 : vector<1x32xf32> to vector<16x32xf32>
    %181 = arith.mulf %179, %180 : vector<16x32xf32>
    %182 = vector.broadcast %161 : vector<1x32xf32> to vector<16x32xf32>
    %183 = arith.addf %181, %182 : vector<16x32xf32>
    %184 = arith.truncf %183 : vector<16x32xf32> to vector<16x32xbf16>
    %c0_60 = arith.constant 0 : index
    %c0_61 = arith.constant 0 : index
    %c0_62 = arith.constant 0 : index
    %185 = vector.load %arg11[%c0_60, %c0_61, %c0_62] : memref<1x32x64xbf16, #tpu.memory_space<vmem>>, vector<1x32x64xbf16>
    %186 = vector.shape_cast %185 : vector<1x32x64xbf16> to vector<32x64xbf16>
    %cst_63 = arith.constant dense<0.000000e+00> : vector<16x64xf32>
    %187 = tpu.matmul %184, %186, %cst_63 {dimension_numbers = #tpu.dot_dimension_numbers<[1], [0], [0], [1], [0, 0, 1, 1], [], []>} : vector<16x32xbf16>, vector<32x64xbf16>, vector<16x64xf32> -> vector<16x64xf32>
    %c0_64 = arith.constant 0 : index
    %c0_65 = arith.constant 0 : index
    %c0_66 = arith.constant 0 : index
    %188 = vector.load %arg12[%c0_64, %c0_65, %c0_66] : memref<1x1x64xf32, #tpu.memory_space<vmem>>, vector<1x1x64xf32>
    %189 = vector.shape_cast %188 : vector<1x1x64xf32> to vector<1x64xf32>
    %190 = vector.broadcast %189 : vector<1x64xf32> to vector<16x64xf32>
    %191 = arith.addf %187, %190 : vector<16x64xf32>
    %cst_67 = arith.constant 5.000000e-01 : f32
    %192 = vector.broadcast %cst_67 : f32 to vector<16x64xf32>
    %193 = arith.mulf %192, %191 : vector<16x64xf32>
    %cst_68 = arith.constant 0.707106769 : f32
    %194 = vector.broadcast %cst_68 : f32 to vector<16x64xf32>
    %195 = arith.mulf %191, %194 : vector<16x64xf32>
    %196 = math.erf %195 : vector<16x64xf32>
    %cst_69 = arith.constant 1.000000e+00 : f32
    %197 = vector.broadcast %cst_69 : f32 to vector<16x64xf32>
    %198 = arith.addf %197, %196 : vector<16x64xf32>
    %199 = arith.mulf %193, %198 : vector<16x64xf32>
    %200 = arith.truncf %199 : vector<16x64xf32> to vector<16x64xbf16>
    %c0_70 = arith.constant 0 : index
    %c0_71 = arith.constant 0 : index
    %c0_72 = arith.constant 0 : index
    %201 = vector.load %arg13[%c0_70, %c0_71, %c0_72] : memref<1x64x32xbf16, #tpu.memory_space<vmem>>, vector<1x64x32xbf16>
    %202 = vector.shape_cast %201 : vector<1x64x32xbf16> to vector<64x32xbf16>
    %cst_73 = arith.constant dense<0.000000e+00> : vector<16x32xf32>
    %203 = tpu.matmul %200, %202, %cst_73 {dimension_numbers = #tpu.dot_dimension_numbers<[1], [0], [0], [1], [0, 0, 1, 1], [], []>} : vector<16x64xbf16>, vector<64x32xbf16>, vector<16x32xf32> -> vector<16x32xf32>
    %c0_74 = arith.constant 0 : index
    %c0_75 = arith.constant 0 : index
    %c0_76 = arith.constant 0 : index
    %204 = vector.load %arg14[%c0_74, %c0_75, %c0_76] : memref<1x1x32xf32, #tpu.memory_space<vmem>>, vector<1x1x32xf32>
    %205 = vector.shape_cast %204 : vector<1x1x32xf32> to vector<1x32xf32>
    %206 = vector.broadcast %205 : vector<1x32xf32> to vector<16x32xf32>
    %207 = arith.addf %203, %206 : vector<16x32xf32>
    %208 = arith.addf %207, %183 : vector<16x32xf32>
    %c0_77 = arith.constant 0 : index
    %c0_78 = arith.constant 0 : index
    %c0_79 = arith.constant 0 : index
    %209 = vector.load %arg15[%c0_77, %c0_78, %c0_79] : memref<1x1x32xf32, #tpu.memory_space<vmem>>, vector<1x1x32xf32>
    %210 = vector.shape_cast %209 : vector<1x1x32xf32> to vector<1x32xf32>
    %c0_80 = arith.constant 0 : index
    %c0_81 = arith.constant 0 : index
    %c0_82 = arith.constant 0 : index
    %211 = vector.load %arg16[%c0_80, %c0_81, %c0_82] : memref<1x1x32xf32, #tpu.memory_space<vmem>>, vector<1x1x32xf32>
    %212 = vector.shape_cast %211 : vector<1x1x32xf32> to vector<1x32xf32>
    %cst_83 = arith.constant dense<0.000000e+00> : vector<16xf32>
    %213 = vector.multi_reduction <add>, %208, %cst_83 [1] : vector<16x32xf32> to vector<16xf32>
    %214 = vector.shape_cast %213 : vector<16xf32> to vector<16x1xf32>
    %cst_84 = arith.constant 3.200000e+01 : f32
    %215 = vector.broadcast %cst_84 : f32 to vector<16x1xf32>
    %216 = arith.divf %214, %215 : vector<16x1xf32>
    %217 = vector.broadcast %216 : vector<16x1xf32> to vector<16x32xf32>
    %218 = arith.subf %208, %217 : vector<16x32xf32>
    %219 = arith.mulf %218, %218 : vector<16x32xf32>
    %cst_85 = arith.constant dense<0.000000e+00> : vector<16xf32>
    %220 = vector.multi_reduction <add>, %219, %cst_85 [1] : vector<16x32xf32> to vector<16xf32>
    %221 = vector.shape_cast %220 : vector<16xf32> to vector<16x1xf32>
    %cst_86 = arith.constant 3.200000e+01 : f32
    %222 = vector.broadcast %cst_86 : f32 to vector<16x1xf32>
    %223 = arith.divf %221, %222 : vector<16x1xf32>
    %224 = vector.broadcast %216 : vector<16x1xf32> to vector<16x32xf32>
    %225 = arith.subf %208, %224 : vector<16x32xf32>
    %cst_87 = arith.constant 9.99999996E-13 : f32
    %226 = vector.broadcast %cst_87 : f32 to vector<16x1xf32>
    %227 = arith.addf %223, %226 : vector<16x1xf32>
    %228 = math.rsqrt %227 : vector<16x1xf32>
    %229 = vector.broadcast %228 : vector<16x1xf32> to vector<16x32xf32>
    %230 = arith.mulf %225, %229 : vector<16x32xf32>
    %231 = vector.broadcast %210 : vector<1x32xf32> to vector<16x32xf32>
    %232 = arith.mulf %230, %231 : vector<16x32xf32>
    %233 = vector.broadcast %212 : vector<1x32xf32> to vector<16x32xf32>
    %234 = arith.addf %232, %233 : vector<16x32xf32>
    %c0_88 = arith.constant 0 : index
    %c0_89 = arith.constant 0 : index
    %235 = vector.load %arg18[%c0_88, %c0_89] : memref<16x32xf32, #tpu.memory_space<vmem>>, vector<16x32xf32>
    tpu.vector_store %arg18[%c0_88, %c0_89], %234 {strides = array<i32>} : memref<16x32xf32, #tpu.memory_space<vmem>>, vector<16x32xf32>,
    %c1_i32 = arith.constant 1 : i32
    %236 = arith.cmpi eq, %arg0, %c1_i32 : i32
    %237 = arith.extui %236 : i1 to i32
    %c0_i32_90 = arith.constant 0 : i32
    %238 = arith.cmpi ne, %237, %c0_i32_90 : i32
    scf.if %238 {
      %239 = vector.extract_strided_slice %234 {offsets = [0, 0], sizes = [1, 32], strides = [1, 1]} : vector<16x32xf32> to vector<1x32xf32>
      %240 = vector.extract_strided_slice %234 {offsets = [8, 0], sizes = [1, 32], strides = [1, 1]} : vector<16x32xf32> to vector<1x32xf32>
      %241 = tpu.concatenate %239, %240 in 0 : vector<1x32xf32>, vector<1x32xf32> -> vector<2x32xf32>
      %c0_91 = arith.constant 0 : index
      %c0_92 = arith.constant 0 : index
      %242 = vector.load %arg17[%c0_91, %c0_92] : memref<2x32xf32, #tpu.memory_space<vmem>>, vector<2x32xf32>
      tpu.vector_store %arg17[%c0_91, %c0_92], %241 {strides = array<i32>} : memref<2x32xf32, #tpu.memory_space<vmem>>, vector<2x32xf32>,
    } else {
    }
    return
  }
  func.func @transform_1(%arg0: i32) -> (i32, i32) {
    %c0_i32 = arith.constant 0 : i32
    %c0_i32_0 = arith.constant 0 : i32
    %c0_i32_1 = arith.constant 0 : i32
    return %c0_i32, %c0_i32_0 : i32, i32
  }
  func.func @transform_2(%arg0: i32) -> (i32, i32) {
    %c0_i32 = arith.constant 0 : i32
    %c0_i32_0 = arith.constant 0 : i32
    %c0_i32_1 = arith.constant 0 : i32
    return %c0_i32, %c0_i32_0 : i32, i32
  }
  func.func @transform_3(%arg0: i32) -> (i32, i32) {
    %c0_i32 = arith.constant 0 : i32
    %c0_i32_0 = arith.constant 0 : i32
    %c0_i32_1 = arith.constant 0 : i32
    return %c0_i32, %c0_i32_0 : i32, i32
  }
  func.func @transform_4(%arg0: i32) -> (i32, i32, i32) {
    %c0_i32 = arith.constant 0 : i32
    %c0_i32_0 = arith.constant 0 : i32
    %c0_i32_1 = arith.constant 0 : i32
    return %arg0, %c0_i32, %c0_i32_0 : i32, i32, i32
  }
  func.func @transform_5(%arg0: i32) -> (i32, i32, i32) {
    %c0_i32 = arith.constant 0 : i32
    %c0_i32_0 = arith.constant 0 : i32
    %c0_i32_1 = arith.constant 0 : i32
    return %arg0, %c0_i32, %c0_i32_0 : i32, i32, i32
  }
  func.func @transform_6(%arg0: i32) -> (i32, i32, i32) {
    %c0_i32 = arith.constant 0 : i32
    %c0_i32_0 = arith.constant 0 : i32
    %c0_i32_1 = arith.constant 0 : i32
    return %arg0, %c0_i32, %c0_i32_0 : i32, i32, i32
  }
  func.func @transform_7(%arg0: i32) -> (i32, i32, i32) {
    %c0_i32 = arith.constant 0 : i32
    %c0_i32_0 = arith.constant 0 : i32
    %c0_i32_1 = arith.constant 0 : i32
    return %arg0, %c0_i32, %c0_i32_0 : i32, i32, i32
  }
  func.func @transform_8(%arg0: i32) -> (i32, i32, i32) {
    %c0_i32 = arith.constant 0 : i32
    %c0_i32_0 = arith.constant 0 : i32
    %c0_i32_1 = arith.constant 0 : i32
    return %arg0, %c0_i32, %c0_i32_0 : i32, i32, i32
  }
  func.func @transform_9(%arg0: i32) -> (i32, i32, i32) {
    %c0_i32 = arith.constant 0 : i32
    %c0_i32_0 = arith.constant 0 : i32
    %c0_i32_1 = arith.constant 0 : i32
    return %arg0, %c0_i32, %c0_i32_0 : i32, i32, i32
  }
  func.func @transform_10(%arg0: i32) -> (i32, i32, i32) {
    %c0_i32 = arith.constant 0 : i32
    %c0_i32_0 = arith.constant 0 : i32
    %c0_i32_1 = arith.constant 0 : i32
    return %arg0, %c0_i32, %c0_i32_0 : i32, i32, i32
  }
  func.func @transform_11(%arg0: i32) -> (i32, i32, i32) {
    %c0_i32 = arith.constant 0 : i32
    %c0_i32_0 = arith.constant 0 : i32
    %c0_i32_1 = arith.constant 0 : i32
    return %arg0, %c0_i32, %c0_i32_0 : i32, i32, i32
  }
  func.func @transform_12(%arg0: i32) -> (i32, i32, i32) {
    %c0_i32 = arith.constant 0 : i32
    %c0_i32_0 = arith.constant 0 : i32
    %c0_i32_1 = arith.constant 0 : i32
    return %arg0, %c0_i32, %c0_i32_0 : i32, i32, i32
  }
  func.func @transform_13(%arg0: i32) -> (i32, i32, i32) {
    %c0_i32 = arith.constant 0 : i32
    %c0_i32_0 = arith.constant 0 : i32
    %c0_i32_1 = arith.constant 0 : i32
    return %arg0, %c0_i32, %c0_i32_0 : i32, i32, i32
  }
  func.func @transform_14(%arg0: i32) -> (i32, i32, i32) {
    %c0_i32 = arith.constant 0 : i32
    %c0_i32_0 = arith.constant 0 : i32
    %c0_i32_1 = arith.constant 0 : i32
    return %arg0, %c0_i32, %c0_i32_0 : i32, i32, i32
  }
  func.func @transform_15(%arg0: i32) -> (i32, i32, i32) {
    %c0_i32 = arith.constant 0 : i32
    %c0_i32_0 = arith.constant 0 : i32
    %c0_i32_1 = arith.constant 0 : i32
    return %arg0, %c0_i32, %c0_i32_0 : i32, i32, i32
  }
  func.func @transform_16(%arg0: i32) -> (i32, i32) {
    %c0_i32 = arith.constant 0 : i32
    %c0_i32_0 = arith.constant 0 : i32
    %c0_i32_1 = arith.constant 0 : i32
    return %c0_i32, %c0_i32_0 : i32, i32
  }
}

</mosaic_0001>

<bundles_post_ra>
// kernel: bert_cls_forward.1
= control target key start
LH: loop header
LB: loop body
LE: loop exit
PB: predicated region body
PF: predicated region fallthrough
CT: control target
= control target key end

     0   :  { %s3523_s0 = inlined_call_operand.vmem [shape: f32[16,32], index: 0, kind: input, shape index: {}]   ;;  %s3524_s1 = inlined_call_operand.vmem [shape: f32[2,8], index: 1, kind: input, shape index: {}]   ;;  %s3525_s2 = inlined_call_operand.vmem [shape: f32[1,32], index: 2, kind: input, shape index: {}]   ;;  %s3526_s3 = inlined_call_operand.vmem [shape: f32[1,32], index: 3, kind: input, shape index: {}]   ;;  %s3527_s4 = inlined_call_operand.vmem [shape: bf16[2,32,96], index: 4, kind: input, shape index: {}]   ;;  %s3528_s5 = inlined_call_operand.vmem [shape: f32[2,1,96], index: 5, kind: input, shape index: {}]   ;;  %s3529_s6 = inlined_call_operand.vmem [shape: bf16[2,32,32], index: 6, kind: input, shape index: {}]   ;;  %s3530_s7 = inlined_call_operand.vmem [shape: f32[2,1,32], index: 7, kind: input, shape index: {}]   ;;  %s3531_s8 = inlined_call_operand.vmem [shape: f32[2,1,32], index: 8, kind: input, shape index: {}]   ;;  %s3532_s9 = inlined_call_operand.vmem [shape: f32[2,1,32], index: 9, kind: input, shape index: {}]   ;;  %s3533_s10 = inlined_call_operand.vmem [shape: bf16[2,32,64], index: 10, kind: input, shape index: {}]   ;;  %s3534_s11 = inlined_call_operand.vmem [shape: f32[2,1,64], index: 11, kind: input, shape index: {}]   ;;  %s3535_s12 = inlined_call_operand.vmem [shape: bf16[2,64,32], index: 12, kind: input, shape index: {}]   ;;  %s3536_s13 = inlined_call_operand.vmem [shape: f32[2,1,32], index: 13, kind: input, shape index: {}]   ;;  %s3537_s14 = inlined_call_operand.vmem [shape: f32[2,1,32], index: 14, kind: input, shape index: {}]   ;;  %s3538_s15 = inlined_call_operand.vmem [shape: f32[2,1,32], index: 15, kind: input, shape index: {}]   ;;  %s3539_s16 = inlined_call_operand.hbm [shape: f32[2,32], index: 16, kind: output, shape index: {}]  }
   0x1   :  { %3544 = sst [smem:[#allocation11_spill]] %s3523_s0 }
   0x2   :  { %3545 = sst [smem:[#allocation12_spill]] %s3524_s1 }
   0x3   :  { %3546 = sst [smem:[#allocation13_spill]] %s3526_s3 }
   0x4   :  { %3547 = sst [smem:[#allocation14_spill]] %s3527_s4 }
   0x5   :  { %3548 = sst [smem:[#allocation15_spill]] %s3529_s6 }
   0x6   :  { %3549 = sst [smem:[#allocation16_spill]] %s3539_s16 }
   0x7   :  { %21 = vsyncpa [#allocation4], 0  ;;  %s3164_s21 = smov 0  }
   0x8 LB: > { %3550 = sst [smem:[#allocation9_spill]] %s3060_s21  ;;  %s3170_s22 = sadd.s32 4294967295, %s3060_s21   ;;  %s3060_s21 = sphi %s3164_s21, %s27_s21  }
   0x9   : > { %p2689_p0 = scmp.ge.s32.totalorder %s3060_s21, 1  ;;  %p528_p1 = scmp.lt.s32.totalorder %s3060_s21, 3 }
   0xb   : > { %p529_p2 = pnand %p2689_p0, %p528_p1 }
   0xd   : > { %532 = sbr.rel (%p529_p2) target bundleno = 3501 (0xdad), region = 80 }
  0x14   : > { %p610_p3 = scmp.lt.s32.totalorder %s3170_s22, 1  ;;  %s3551_s4 = sld [smem:[#allocation14_spill]] }
  0x15   : > { %s3552_s6 = sld [smem:[#allocation15_spill]]  ;;  %p2698_p4 = scmp.ne.s32.totalorder %s3170_s22, 0 }
  0x16   : > { %s3176_s23 = scalar_select %p610_p3, %s3170_s22, 1 }
  0x17   : > { %658 = sbr.rel (%p2698_p4) target bundleno = 363 (0x16b), region = 84 }
  0x18   : > { %s2752_s24 = sshll.u32 %s3176_s23, 4  ;;  %s647_s25 = scalar_lea.vmem %s3536_s13, %s3176_s23 }
  0x19   : > { %s650_s28 = scalar_lea.vmem %s3537_s14, %s3176_s23  ;;  %s653_s3 = scalar_lea.vmem %s3538_s15, %s3176_s23 }
  0x1a   : > { %s3186_s30 = scalar_lea.vmem %s3551_s4, %s2752_s24  ;;  %s3208_s4 = scalar_lea.vmem %s3533_s10, %s2752_s24 }
  0x1b   : > { %s3191_s18 = scalar_lea.vmem %s3552_s6, %s2752_s24  ;;  %s639_s6 = scalar_lea.vmem %s3534_s11, %s3176_s23 }
  0x1c   : > { %3553 = sst [smem:[#allocation10_spill]] %s3191_s18  ;;  %s2755_s18 = sshll.u32 %s3176_s23, 5 }
  0x1d   : > { %s3218_s21 = scalar_lea.vmem %s3535_s12, %s2755_s18 }
  0x1e   : > { %s3554_s19 = sld [smem:[#allocation11_spill]] }
  0x24   : > { %v691_v0 = vld [vmem:[%s3554_s19] sm:$0xff]  ;;  %v693_v1 = vld [vmem:[%s3554_s19 + $0x8] sm:$0xff] }
  0x25   : > { %692 = vst [vmem:[#allocation2] sm:$0xff] %v691_v0  ;;  %694 = vst [vmem:[#allocation2 + $0x8] sm:$0xff] %v693_v1 }
  0x26   : > { %702 = vsyncadd [#allocation5], 256 }
  0x27   : > { %3052 = dma.done.wait [#allocation5], 256 }
  0x28   : > { %3053 = vsyncadd [#allocation5], 4294967040  ;;  %vm710_vm0 = vcmask 261120   ;;  %v2699_v23 = vld [vmem:[%s3525_s2] ss:$0 sm:$0xff]  ;;  %s3555_s24 = sld [smem:[#allocation13_spill]] }
  0x2c   : > { %v706_v2 = vld [vmem:[#allocation2] sm:$0xff]  ;;  %v707_v3 = vld [vmem:[#allocation2 + $0x8] sm:$0xff] }
  0x2d   : > { %v711_v4 = vsel %vm710_vm0, %v706_v2, 0.0  ;;  %v714_v5 = vsel %vm710_vm0, %v707_v3, 0.0 }
  0x2e   : > { %712 = vadd.xlane.f32.xlu0 %v711_v4  ;;  %v2700_v25 = vld [vmem:[%s3555_s24] ss:$0 sm:$0xff] }
  0x32   : > { %715 = vadd.xlane.f32.xlu0 %v714_v5 }
  0xbb   : > { %v713_v6 = vpop.xlane.xlu0 %712 }
  0xbc   : > { %v718_v7 = vmul.f32 0.03125, %v713_v6 }
  0xbe   : > { %v720_v8 = vsub.f32 %v706_v2, %v718_v7 }
  0xbf   : > { %v716_v9 = vpop.xlane.xlu0 %715 }
  0xc0   : > { %v719_v10 = vmul.f32 0.03125, %v716_v9  ;;  %v722_v11 = vmul.f32 %v720_v8, %v720_v8 }
  0xc2   : > { %v721_v12 = vsub.f32 %v707_v3, %v719_v10  ;;  %v724_v13 = vsel %vm710_vm0, %v722_v11, 0.0 }
  0xc3   : > { %725 = vadd.xlane.f32.xlu1 %v724_v13 }
  0xc4   : > { %v723_v14 = vmul.f32 %v721_v12, %v721_v12 }
  0xc6   : > { %v727_v15 = vsel %vm710_vm0, %v723_v14, 0.0 }
  0xc7   : > { %728 = vadd.xlane.f32.xlu1 %v727_v15 }
 0x150   : > { %v726_v16 = vpop.xlane.xlu1 %725 }
 0x151   : > { %v730_v17 = vmul.f32 0.03125, %v726_v16 }
 0x153   : > { %v732_v18 = vadd.f32 1e-12, %v730_v17 }
 0x154   : > { %v729_v19 = vpop.xlane.xlu1 %728 }
 0x155   : > { %2949 = vrsqrt.f32 %v732_v18  ;;  %v731_v20 = vmul.f32 0.03125, %v729_v19 }
 0x157   : > { %v733_v21 = vadd.f32 1e-12, %v731_v20 }
 0x159   : > { %2951 = vrsqrt.f32 %v733_v21 }
 0x15f   : > { %v2950_v22 = vpop.eup %2949 }
 0x160   : > { %v736_v24 = vmul.f32 %v2950_v22, %v720_v8 }
 0x162   : > { %v744_v26 = vmul.f32 %v2699_v23, %v736_v24 }
 0x163   : > { %v2952_v27 = vpop.eup %2951 }
 0x164   : > { %v752_v28 = vadd.f32 %v2700_v25, %v744_v26  ;;  %v737_v29 = vmul.f32 %v2952_v27, %v721_v12 }
 0x166   : > { %754 = vst.msk [vmem:[#allocation2] sm:$0xff] %vm710_vm0, %v752_v28  ;;  %v745_v30 = vmul.f32 %v2699_v23, %v737_v29 }
 0x168   : > { %v753_v31 = vadd.f32 %v2700_v25, %v745_v30 }
 0x16a   : > { %755 = vst.msk [vmem:[#allocation2 + $0x8] sm:$0xff] %vm710_vm0, %v753_v31 }
 0x16b PF: > { %v2968_v32 = vld [vmem:[%s3186_s30] sm:$0xff]   ;;  %v3062_v33 = vmov 0.0   ;;  %v2969_v34 = vld [vmem:[%s3186_s30 + $0x8] sm:$0xff]   ;;  %vm3063_vm1 = vmmov 0   ;;  %vm782_vm2 = vcmask 261120   ;;  %s3556_s0 = scalar_lea.vmem %s3528_s5, %s3176_s23  ;;  %s3064_s17 = smov 64   ;;  %v828_v47 = vlaneseq }
 0x16c   : > { %2802 = vmatprep.subr.bf16.mxu0 %v3062_v33  ;;  %2815 = vmatprep.subr.mxu1 %v3062_v33  ;;  %v2701_v38 = vld [vmem:[%s3556_s0] ss:$0 sm:$0xff]  ;;  %s3065_s18 = smov 96   ;;  %s3066_s20 = smov 88   ;;  %vm835_vm3 = vcmask 64512   ;;  %vm1505_vm4 = vcmask 130048  }
 0x16d   : > { %2803 = vmatpush3.bf16.msra.mxu0 %v2968_v32  ;;  %2806 = vmatprep.mubr.msk.bf16.mxu0 %vm3063_vm1, %v3062_v33  ;;  %v3257_v35 = vld [vmem:[#allocation2] sm:$0xff]  ;;  %s3067_s27 = smov 120   ;;  %s3068_s1 = smov 80   ;;  %v3298_v48 = vshrl.u32 %v828_v47, 7  ;;  %vm1507_vm5 = vcmask 195584   ;;  %vm2420_vm6 = vcmask 523264  }
 0x16e   : > { %2804 = vmatprep.subr.bf16.mxu0 %v3062_v33  ;;  %2817 = vmatprep.mubr.msk.f32.mxu1 %vm3063_vm1, %v3062_v33  ;;  %s3069_s16 = smov 112   ;;  %s3070_s26 = smov 104  }
 0x16f   : > { %v830_v49 = vsub.s32 0, %v3298_v48  ;;  %s3557_s29 = sld [smem:[#allocation12_spill]]  ;;  %s3071_s0 = smov 72   ;;  %v1511_v22 = vsub.s32 1, %v3298_v48 }
 0x170   : > { %p2747_p5 = scmp.ne.s32.totalorder %s3170_s22, 1 }
 0x171   : > { %v3259_v36 = vld [vmem:[#allocation2 + $0x8] sm:$0xff]  ;;  %2805 = vmatpush3.bf16.msra.mxu0 %v2969_v34  ;;  %vm2520_vm7 = vcmask (!%p2747_p5), 1040384   ;;  %vm2522_vm8 = vcmask (!%p2747_p5), 254976  }
 0x172   : > { %v758_v37 = vpack.c.bf16 %v3259_v36, %v3257_v35  ;;  %2810 = vmatprep.subr.mxu0 %v3062_v33 }
 0x174   : > { %2807 = vmatmul.mubr.msk.bf16.vlgmr.msra.gmra.mrb[0].mxu0 %vm782_vm2, %v758_v37 }
 0x175   : > { %2812 = vmatprep.mubr.msk.f32.mxu0 %vm3063_vm1, %v3062_v33  ;;  %v3304_v50 = vld [vmem:[%s3557_s29] sm:$0x3]  ;;  %s3559_s29 = scalar_lea.vmem %s3530_s7, %s3176_s23 }
 0x176   : > { %v3307_v51 = vrot.slane %v3304_v50, %v830_v49  ;;  %v1512_v27 = vrot.slane %v3304_v50, %v1511_v22 }
 0x247   : > { %v820_v39 = vpop.f32.mrb[0].mxu0 }
 0x248   : > { %v3275_v40 = vadd.f32 %v2701_v38, %v820_v39  ;;  %v2808_v41 = vpop.f32.mrb[1].mxu0 }
 0x249   : > { %v823_v42 = vpop.f32.mrb[2].mxu0 }
 0x24a   : > { %v3277_v43 = vadd.f32 %v2701_v38, %v823_v42  ;;  %921 = vrot.lane.b32.xlu1 %v3275_v40, %s3064_s17  ;;  %833 = vrot.lane.b32.xlu0 %v3275_v40, %s3065_s18  ;;  %v2809_v44 = vpop.f32.mrb[3].mxu0 }
 0x24e   : > { %999 = vrot.lane.b32.xlu1 %v3275_v40, %s3066_s20 }
 0x252   : > { %997 = vrot.lane.b32.xlu1 %v3275_v40, %s3067_s27 }
 0x256   : > { %1164 = vrot.lane.b32.xlu1 %v3275_v40, %s3068_s1 }
 0x25a   : > { %1162 = vrot.lane.b32.xlu1 %v3275_v40, %s3069_s16 }
 0x25e   : > { %1327 = vrot.lane.b32.xlu1 %v3275_v40, %s3070_s26 }
 0x2bc   : > { %v922_v45 = vpop.permute.xlu1 %921  ;;  %v834_v46 = vpop.permute.xlu0 %833 }
 0x2bd   : > { %2811 = vmatpush3.xpose.msk.msra.mxu0 %vm835_vm3, %v834_v46  ;;  %2816 = vmatpush3.msra.mxu1 %v922_v45 }
 0x2be   : > { %2820 = vmatprep.subr.mxu1 %v3062_v33  ;;  %2825 = vmatprep.subr.mxu0 %v3062_v33 }
 0x2c0   : > { %2813 = vmatmul.mubr.msk.f32.vlgmr.msra.gmra.mrb[4].mxu0 %vm835_vm3, %v3275_v40  ;;  %v1000_v61 = vpop.permute.xlu1 %999 }
 0x2c1   : > { %2827 = vmatprep.mubr.msk.f32.mxu0 %vm3063_vm1, %v3062_v33 }
 0x2c4   : > { %v998_v62 = vpop.permute.xlu1 %997 }
 0x2c8   : > { %v1165_v63 = vpop.permute.xlu1 %1164 }
 0x2cc   : > { %v1163_v0 = vpop.permute.xlu1 %1162 }
 0x2d0   : > { %v1328_v1 = vpop.permute.xlu1 %1327 }
 0x393   : > { %v906_v52 = vpop.f32.mrb[4].mxu0 }
 0x394   : > { %v907_v53 = vadd.f32 %v906_v52, %v3307_v51  ;;  %v2814_v54 = vpop.f32.mrb[5].mxu0 }
 0x396   : > { %v910_v55 = vsel %vm835_vm3, %v907_v53, -inf }
 0x397   : > { %911 = vmax.xlane.f32.xlu0 %v910_v55 }
 0x3ad   : > { %1329 = vrot.lane.b32.xlu0 %v3275_v40, %s3071_s0 }
 0x3b1   : > { %1842 = vrot.lane.b32.xlu0 %v3277_v43, %s3069_s16  ;;  %s3076_s16 = smov 16  }
 0x3b5   : > { %2007 = vrot.lane.b32.xlu0 %v3277_v43, %s3070_s26  ;;  %s3077_s26 = smov 24  }
 0x424   : > { %v912_v56 = vpop.xlane.xlu0 %911 }
 0x425   : > { %v913_v57 = vsub.f32 %v907_v53, %v912_v56 }
 0x427   : > { %v914_v58 = vmul.f32 1.442695, %v913_v57 }
 0x428   : > { %v1330_v7 = vpop.permute.xlu0 %1329 }
 0x429   : > { %2978 = vpow2.f32 %v914_v58 }
 0x42c   : > { %v1843_v10 = vpop.permute.xlu0 %1842 }
 0x430   : > { %v2008_v12 = vpop.permute.xlu0 %2007 }
 0x433   : > { %v2979_v59 = vpop.eup %2978 }
 0x434   : > { %v916_v60 = vsel %vm835_vm3, %v2979_v59, 0.0 }
 0x435   : > { %917 = vadd.xlane.f32.xlu1 %v916_v60 }
 0x446   : > { %1514 = vrot.lane.b32.xlu1 %v3277_v43, %s3065_s18  ;;  %s3072_s18 = smov 48  }
 0x44a   : > { %1679 = vrot.lane.b32.xlu1 %v3277_v43, %s3066_s20  ;;  %s3073_s20 = smov 40  }
 0x44e   : > { %1677 = vrot.lane.b32.xlu1 %v3277_v43, %s3067_s27  ;;  %s3074_s27 = smov 56  }
 0x452   : > { %1844 = vrot.lane.b32.xlu1 %v3277_v43, %s3068_s1  ;;  %s3075_s1 = smov 8  }
 0x456   : > { %2009 = vrot.lane.b32.xlu1 %v3277_v43, %s3071_s0 }
 0x4c2   : > { %v918_v2 = vpop.xlane.xlu1 %917 }
 0x4c3   : > { %2980 = vrcp.f32 %v918_v2 }
 0x4c6   : > { %v1515_v5 = vpop.permute.xlu1 %1514 }
 0x4ca   : > { %v1680_v6 = vpop.permute.xlu1 %1679 }
 0x4cd   : > { %v2981_v3 = vpop.eup %2980 }
 0x4ce   : > { %v920_v4 = vmul.f32 %v2981_v3, %v2979_v59  ;;  %v1678_v8 = vpop.permute.xlu1 %1677 }
 0x4d0   : > { %2818 = vmatmul.mubr.msk.f32.vlgmr.msra.gmra.mrb[0].mxu1 %vm835_vm3, %v920_v4 }
 0x4d1   : > { %2821 = vmatpush3.xpose.msk.msra.mxu1 %vm835_vm3, %v1000_v61  ;;  %2822 = vmatprep.mubr.msk.f32.mxu1 %vm3063_vm1, %v3062_v33 }
 0x4d2   : > { %2830 = vmatprep.subr.mxu1 %v3062_v33  ;;  %v1845_v9 = vpop.permute.xlu1 %1844 }
 0x4d4   : > { %2823 = vmatmul.mubr.msk.f32.vlgmr.msra.gmra.mrb[2].mxu1 %vm835_vm3, %v998_v62 }
 0x4d5   : > { %2831 = vmatpush3.xpose.msk.msra.mxu1 %vm835_vm3, %v1165_v63  ;;  %2832 = vmatprep.mubr.msk.f32.mxu1 %vm3063_vm1, %v3062_v33 }
 0x4d6   : > { %2840 = vmatprep.subr.mxu1 %v3062_v33  ;;  %v2010_v11 = vpop.permute.xlu1 %2009 }
 0x4d8   : > { %2833 = vmatmul.mubr.msk.f32.vlgmr.msra.gmra.mrb[4].mxu1 %vm835_vm3, %v1163_v0 }
 0x4d9   : > { %2841 = vmatpush3.xpose.msk.msra.mxu1 %vm835_vm3, %v1330_v7  ;;  %2842 = vmatprep.mubr.msk.f32.mxu1 %vm3063_vm1, %v3062_v33 }
 0x4da   : > { %2850 = vmatprep.subr.mxu1 %v3062_v33 }
 0x4dc   : > { %2843 = vmatmul.mubr.msk.f32.vlgmr.msra.gmra.mrb[6].mxu1 %vm835_vm3, %v1328_v1 }
 0x4dd   : > { %2851 = vmatpush3.xpose.msk.msra.mxu1 %vm835_vm3, %v1515_v5  ;;  %2852 = vmatprep.mubr.msk.f32.mxu1 %vm3063_vm1, %v3062_v33 }
 0x4de   : > { %2860 = vmatprep.subr.mxu1 %v3062_v33 }
 0x4e0   : > { %2853 = vmatmul.mubr.msk.f32.vlgmr.msra.gmra.mrb[8].mxu1 %vm835_vm3, %v3277_v43 }
 0x4e1   : > { %2861 = vmatpush3.xpose.msk.msra.mxu1 %vm835_vm3, %v1680_v6  ;;  %2862 = vmatprep.mubr.msk.f32.mxu1 %vm3063_vm1, %v3062_v33 }
 0x4e2   : > { %2870 = vmatprep.subr.mxu1 %v3062_v33 }
 0x4e4   : > { %2863 = vmatmul.mubr.msk.f32.vlgmr.msra.gmra.mrb[10].mxu1 %vm835_vm3, %v1678_v8 }
 0x4e5   : > { %2871 = vmatpush3.xpose.msk.msra.mxu1 %vm835_vm3, %v1845_v9  ;;  %2872 = vmatprep.mubr.msk.f32.mxu1 %vm3063_vm1, %v3062_v33 }
 0x4e6   : > { %2880 = vmatprep.subr.mxu1 %v3062_v33 }
 0x4e8   : > { %2873 = vmatmul.mubr.msk.f32.vlgmr.msra.gmra.mrb[12].mxu1 %vm835_vm3, %v1843_v10 }
 0x4e9   : > { %2881 = vmatpush3.xpose.msk.msra.mxu1 %vm835_vm3, %v2010_v11  ;;  %2882 = vmatprep.mubr.msk.f32.mxu1 %vm3063_vm1, %v3062_v33 }
 0x4ea   : > { %2890 = vmatprep.subr.bf16.mxu1 %v3062_v33 }
 0x4ec   : > { %2883 = vmatmul.mubr.msk.f32.vlgmr.msra.gmra.mrb[14].mxu1 %vm835_vm3, %v2008_v12 }
 0x4ed   : > { %2894 = vmatprep.mubr.msk.bf16.mxu1 %vm3063_vm1, %v3062_v33 }
 0x5a3   : > { %v3363_v13 = vpop.f32.mrb[0].mxu1 }
 0x5a4   : > { %v2819_v14 = vpop.f32.mrb[1].mxu1 }
 0x5a7   : > { %v1071_v15 = vpop.f32.mrb[2].mxu1 }
 0x5a8   : > { %v1072_v16 = vadd.f32 %v1071_v15, %v3307_v51  ;;  %v2824_v17 = vpop.f32.mrb[3].mxu1 }
 0x5aa   : > { %v1075_v18 = vsel %vm835_vm3, %v1072_v16, -inf }
 0x5ab   : > { %1076 = vmax.xlane.f32.xlu1 %v1075_v18  ;;  %v1236_v19 = vpop.f32.mrb[4].mxu1 }
 0x5ac   : > { %v1237_v20 = vadd.f32 %v1236_v19, %v3307_v51  ;;  %v2834_v21 = vpop.f32.mrb[5].mxu1 }
 0x5ae   : > { %v1240_v23 = vsel %vm835_vm3, %v1237_v20, -inf }
 0x5af   : > { %1241 = vmax.xlane.f32.xlu0 %v1240_v23  ;;  %v1401_v24 = vpop.f32.mrb[6].mxu1 }
 0x5b0   : > { %v1402_v25 = vadd.f32 %v1401_v24, %v3307_v51  ;;  %v2844_v26 = vpop.f32.mrb[7].mxu1 }
 0x5b2   : > { %v1405_v28 = vsel %vm835_vm3, %v1402_v25, -inf }
 0x5b3   : > { %1406 = vmax.xlane.f32.xlu0 %v1405_v28  ;;  %v1586_v29 = vpop.f32.mrb[8].mxu1 }
 0x5b4   : > { %v1587_v30 = vadd.f32 %v1586_v29, %v1512_v27  ;;  %v2854_v31 = vpop.f32.mrb[9].mxu1 }
 0x5b6   : > { %v1590_v32 = vsel %vm835_vm3, %v1587_v30, -inf }
 0x5b7   : > { %1591 = vmax.xlane.f32.xlu1 %v1590_v32  ;;  %v1751_v34 = vpop.f32.mrb[10].mxu1 }
 0x5b8   : > { %v1752_v37 = vadd.f32 %v1751_v34, %v1512_v27  ;;  %v2864_v38 = vpop.f32.mrb[11].mxu1 }
 0x5ba   : > { %v1755_v39 = vsel %vm835_vm3, %v1752_v37, -inf }
 0x5bb   : > { %1756 = vmax.xlane.f32.xlu0 %v1755_v39  ;;  %v1916_v41 = vpop.f32.mrb[12].mxu1 }
 0x5bc   : > { %v1917_v42 = vadd.f32 %v1916_v41, %v1512_v27  ;;  %v2874_v44 = vpop.f32.mrb[13].mxu1 }
 0x5be   : > { %v1920_v45 = vsel %vm835_vm3, %v1917_v42, -inf }
 0x5bf   : > { %1921 = vmax.xlane.f32.xlu1 %v1920_v45  ;;  %v2081_v46 = vpop.f32.mrb[14].mxu1 }
 0x5c0   : > { %v2082_v47 = vadd.f32 %v2081_v46, %v1512_v27  ;;  %v2884_v48 = vpop.f32.mrb[15].mxu1 }
 0x5c2   : > { %v2085_v49 = vsel %vm835_vm3, %v2082_v47, -inf }
 0x5c3   : > { %2086 = vmax.xlane.f32.xlu0 %v2085_v49 }
 0x5d0   : > { %1251 = vrot.lane.b32.xlu1 %v3275_v40, %s3072_s18 }
 0x5d4   : > { %1416 = vrot.lane.b32.xlu1 %v3275_v40, %s3073_s20 }
 0x5d9   : > { %1086 = vrot.lane.b32.xlu0 %v3275_v40, %s3074_s27 }
 0x638   : > { %v1077_v50 = vpop.xlane.xlu1 %1076 }
 0x639   : > { %v1078_v51 = vsub.f32 %v1072_v16, %v1077_v50 }
 0x63b   : > { %v1079_v52 = vmul.f32 1.442695, %v1078_v51 }
 0x63c   : > { %v1242_v53 = vpop.xlane.xlu0 %1241 }
 0x63d   : > { %2982 = vpow2.f32 %v1079_v52  ;;  %v1243_v54 = vsub.f32 %v1237_v20, %v1242_v53 }
 0x63f   : > { %v1244_v55 = vmul.f32 1.442695, %v1243_v54 }
 0x640   : > { %v1407_v57 = vpop.xlane.xlu0 %1406 }
 0x641   : > { %2984 = vpow2.f32 %v1244_v55  ;;  %v1408_v63 = vsub.f32 %v1402_v25, %v1407_v57 }
 0x643   : > { %v1409_v2 = vmul.f32 1.442695, %v1408_v63 }
 0x644   : > { %v1592_v0 = vpop.xlane.xlu1 %1591 }
 0x645   : > { %v1593_v1 = vsub.f32 %v1587_v30, %v1592_v0  ;;  %2986 = vpow2.f32 %v1409_v2 }
 0x647   : > { %v2983_v56 = vpop.eup %2982  ;;  %v1594_v5 = vmul.f32 1.442695, %v1593_v1 }
 0x648   : > { %v1081_v58 = vsel %vm835_vm3, %v2983_v56, 0.0  ;;  %v1757_v60 = vpop.xlane.xlu0 %1756 }
 0x649   : > { %1082 = vadd.xlane.f32.xlu1 %v1081_v58  ;;  %v1758_v3 = vsub.f32 %v1752_v37, %v1757_v60  ;;  %2988 = vpow2.f32 %v1594_v5 }
 0x64b   : > { %v2985_v59 = vpop.eup %2984  ;;  %v1759_v7 = vmul.f32 1.442695, %v1758_v3 }
 0x64c   : > { %v1246_v61 = vsel %vm835_vm3, %v2985_v59, 0.0  ;;  %v1922_v4 = vpop.xlane.xlu1 %1921 }
 0x64d   : > { %1247 = vadd.xlane.f32.xlu0 %v1246_v61  ;;  %v1923_v6 = vsub.f32 %v1917_v42, %v1922_v4  ;;  %2990 = vpow2.f32 %v1759_v7 }
 0x64f   : > { %v1924_v9 = vmul.f32 1.442695, %v1923_v6  ;;  %v2987_v11 = vpop.eup %2986 }
 0x650   : > { %v2087_v62 = vpop.xlane.xlu0 %2086  ;;  %v1411_v14 = vsel %vm835_vm3, %v2987_v11, 0.0  ;;  %v1252_v22 = vpop.permute.xlu1 %1251 }
 0x651   : > { %v2088_v8 = vsub.f32 %v2082_v47, %v2087_v62  ;;  %2992 = vpow2.f32 %v1924_v9 }
 0x653   : > { %v2089_v10 = vmul.f32 1.442695, %v2088_v8  ;;  %v2989_v12 = vpop.eup %2988 }
 0x654   : > { %v1087_v40 = vpop.permute.xlu0 %1086  ;;  %v1596_v17 = vsel %vm835_vm3, %v2989_v12, 0.0  ;;  %v1417_v23 = vpop.permute.xlu1 %1416 }
 0x655   : > { %2826 = vmatpush3.msra.mxu0 %v1087_v40  ;;  %2994 = vpow2.f32 %v2089_v10 }
 0x656   : > { %2835 = vmatprep.subr.mxu0 %v3062_v33 }
 0x657   : > { %v2991_v15 = vpop.eup %2990 }
 0x658   : > { %v1761_v18 = vsel %vm835_vm3, %v2991_v15, 0.0 }
 0x65a   : > { %1766 = vrot.lane.b32.xlu1 %v3277_v43, %s3074_s27 }
 0x65b   : > { %v2993_v16 = vpop.eup %2992 }
 0x65c   : > { %v1926_v20 = vsel %vm835_vm3, %v2993_v16, 0.0 }
 0x65f   : > { %v3391_v19 = vpop.eup %2994 }
 0x660   : > { %v2091_v21 = vsel %vm835_vm3, %v3391_v19, 0.0 }
 0x663   : > { %1601 = vrot.lane.b32.xlu0 %v3277_v43, %s3064_s17  ;;  %s3558_s17 = sld [smem:[#allocation10_spill]] }
 0x669   : > { %v2971_v62 = vld [vmem:[%s3558_s17 + $0x8] sm:$0xff]  }
 0x67e   : > { %1412 = vadd.xlane.f32.xlu1 %v1411_v14 }
 0x682   : > { %1597 = vadd.xlane.f32.xlu0 %v1596_v17  ;;  %1762 = vadd.xlane.f32.xlu1 %v1761_v18 }
 0x686   : > { %1927 = vadd.xlane.f32.xlu0 %v1926_v20  ;;  %2092 = vadd.xlane.f32.xlu1 %v2091_v21 }
 0x697   : > { %2096 = vrot.lane.b32.xlu1 %v3277_v43, %s3073_s20  ;;  %s3560_s20 = scalar_lea.vmem %s3531_s8, %s3176_s23 }
 0x69c   : > { %1931 = vrot.lane.b32.xlu0 %v3277_v43, %s3072_s18 }
 0x6d6   : > { %v1083_v24 = vpop.xlane.xlu1 %1082 }
 0x6d7   : > { %2996 = vrcp.f32 %v1083_v24  ;;  %v2729_v24 = vld [vmem:[%s3559_s29] ss:$0 sm:$0xff] }
 0x6da   : > { %v1248_v25 = vpop.xlane.xlu0 %1247  ;;  %v1767_v43 = vpop.permute.xlu1 %1766 }
 0x6db   : > { %2998 = vrcp.f32 %v1248_v25 }
 0x6de   : > { %v1602_v30 = vpop.permute.xlu0 %1601 }
 0x6e1   : > { %v2997_v26 = vpop.eup %2996 }
 0x6e2   : > { %v1085_v27 = vmul.f32 %v2997_v26, %v2983_v56 }
 0x6e4   : > { %2828 = vmatmul.mubr.msk.f32.vlgmr.msra.gmra.mrb[6].mxu0 %vm835_vm3, %v1085_v27 }
 0x6e5   : > { %v2999_v28 = vpop.eup %2998  ;;  %2836 = vmatpush3.msra.mxu0 %v1252_v22  ;;  %2837 = vmatprep.mubr.msk.f32.mxu0 %vm3063_vm1, %v3062_v33 }
 0x6e6   : > { %v1250_v29 = vmul.f32 %v2999_v28, %v2985_v59  ;;  %2845 = vmatprep.subr.mxu0 %v3062_v33  ;;  %v2970_v59 = vld [vmem:[%s3558_s17] sm:$0xff]   ;;  %s3561_s17 = scalar_lea.vmem %s3532_s9, %s3176_s23 }
 0x6e7   : > { %2891 = vmatpush3.bf16.msra.mxu1 %v2970_v59 }
 0x6e8   : > { %2838 = vmatmul.mubr.msk.f32.vlgmr.msra.gmra.mrb[8].mxu0 %vm835_vm3, %v1250_v29  ;;  %2892 = vmatprep.subr.bf16.mxu1 %v3062_v33 }
 0x6e9   : > { %2846 = vmatpush3.msra.mxu0 %v1417_v23  ;;  %2847 = vmatprep.mubr.msk.f32.mxu0 %vm3063_vm1, %v3062_v33 }
 0x6ea   : > { %2855 = vmatprep.subr.mxu0 %v3062_v33 }
 0x6eb   : > { %2893 = vmatpush3.bf16.msra.mxu1 %v2971_v62 }
 0x6ec   : > { %2906 = vmatprep.subr.bf16.mxu1 %v3062_v33 }
 0x70b   : > { %v1413_v31 = vpop.xlane.xlu1 %1412 }
 0x70c   : > { %3000 = vrcp.f32 %v1413_v31 }
 0x70f   : > { %v1598_v32 = vpop.xlane.xlu0 %1597  ;;  %v1763_v34 = vpop.xlane.xlu1 %1762 }
 0x710   : > { %3002 = vrcp.f32 %v1598_v32 }
 0x711   : > { %3004 = vrcp.f32 %v1763_v34 }
 0x713   : > { %v1928_v37 = vpop.xlane.xlu0 %1927  ;;  %v2093_v41 = vpop.xlane.xlu1 %2092 }
 0x714   : > { %3006 = vrcp.f32 %v1928_v37 }
 0x715   : > { %3008 = vrcp.f32 %v2093_v41 }
 0x716   : > { %v3001_v38 = vpop.eup %3000 }
 0x717   : > { %v1415_v39 = vmul.f32 %v3001_v38, %v2987_v11  ;;  %v1932_v48 = vpop.permute.xlu0 %1931  ;;  %v2097_v51 = vpop.permute.xlu1 %2096 }
 0x719   : > { %2848 = vmatmul.mubr.msk.f32.vlgmr.msra.gmra.mrb[10].mxu0 %vm835_vm3, %v1415_v39 }
 0x71a   : > { %2856 = vmatpush3.msra.mxu0 %v1602_v30  ;;  %2857 = vmatprep.mubr.msk.f32.mxu0 %vm3063_vm1, %v3062_v33  ;;  %v3003_v42 = vpop.eup %3002 }
 0x71b   : > { %2865 = vmatprep.subr.mxu0 %v3062_v33  ;;  %v1600_v44 = vmul.f32 %v3003_v42, %v2989_v12  ;;  %v3005_v45 = vpop.eup %3004 }
 0x71c   : > { %v1765_v46 = vmul.f32 %v3005_v45, %v2991_v15 }
 0x71d   : > { %2858 = vmatmul.mubr.msk.f32.vlgmr.msra.gmra.mrb[12].mxu0 %vm835_vm3, %v1600_v44 }
 0x71e   : > { %2866 = vmatpush3.msra.mxu0 %v1767_v43  ;;  %2867 = vmatprep.mubr.msk.f32.mxu0 %vm3063_vm1, %v3062_v33  ;;  %v3007_v47 = vpop.eup %3006 }
 0x71f   : > { %2875 = vmatprep.subr.mxu0 %v3062_v33  ;;  %v1930_v49 = vmul.f32 %v3007_v47, %v2993_v16  ;;  %v3009_v50 = vpop.eup %3008  ;;  %v2973_v47 = vld [vmem:[%s3208_s4 + $0x8] sm:$0xff]  }
 0x720   : > { %v2095_v52 = vmul.f32 %v3009_v50, %v3391_v19 }
 0x721   : > { %2868 = vmatmul.mubr.msk.f32.vlgmr.msra.gmra.mrb[14].mxu0 %vm835_vm3, %v1765_v46 }
 0x722   : > { %2876 = vmatpush3.msra.mxu0 %v1932_v48  ;;  %2877 = vmatprep.mubr.msk.f32.mxu0 %vm3063_vm1, %v3062_v33 }
 0x723   : > { %2885 = vmatprep.subr.mxu0 %v3062_v33 }
 0x725   : > { %2878 = vmatmul.mubr.msk.f32.vlgmr.msra.gmra.mrb[16].mxu0 %vm835_vm3, %v1930_v49 }
 0x726   : > { %2886 = vmatpush3.msra.mxu0 %v2097_v51  ;;  %2887 = vmatprep.mubr.msk.f32.mxu0 %vm3063_vm1, %v3062_v33 }
 0x727   : > { %2898 = vmatprep.subr.bf16.mxu0 %v3062_v33 }
 0x729   : > { %2888 = vmatmul.mubr.msk.f32.vlgmr.msra.gmra.mrb[18].mxu0 %vm835_vm3, %v2095_v52 }
 0x72a   : > { %2902 = vmatprep.mubr.msk.bf16.mxu0 %vm3063_vm1, %v3062_v33 }
 0x7b7   : > { %v1158_v53 = vpop.f32.mrb[6].mxu0 }
 0x7b8   : > { %v2829_v54 = vpop.f32.mrb[7].mxu0 }
 0x7bb   : > { %v1323_v55 = vpop.f32.mrb[8].mxu0 }
 0x7bc   : > { %v2839_v56 = vpop.f32.mrb[9].mxu0 }
 0x7ec   : > { %v1488_v57 = vpop.f32.mrb[10].mxu0 }
 0x7ed   : > { %v2849_v58 = vpop.f32.mrb[11].mxu0 }
 0x7f0   : > { %v1673_v60 = vpop.f32.mrb[12].mxu0 }
 0x7f1   : > { %v2859_v61 = vpop.f32.mrb[13].mxu0 }
 0x7f4   : > { %v1838_v40 = vpop.f32.mrb[14].mxu0 }
 0x7f5   : > { %v2953_v63 = vpack.i.bf16 %v1838_v40, %v1158_v53  ;;  %v2869_v0 = vpop.f32.mrb[15].mxu0 }
 0x7f6   : > { %v2974_v0 = vld [vmem:[%s3218_s21] sm:$0xff]  }
 0x7f7   : > { %2954 = vrot.lane.b32.xlu0 %v2953_v63, %s3075_s1 }
 0x7f8   : > { %v2003_v1 = vpop.f32.mrb[16].mxu0 }
 0x7f9   : > { %v2958_v2 = vpack.i.bf16 %v2003_v1, %v1323_v55  ;;  %v2879_v3 = vpop.f32.mrb[17].mxu0  ;;  %v2733_v55 = vld [vmem:[%s3560_s20] ss:$0 sm:$0xff]  ;;  %v2975_v1 = vld [vmem:[%s3218_s21 + $0x8] sm:$0xff]  }
 0x7fa   : > { %v2977_v3 = vld [vmem:[%s3218_s21 + $0x18] sm:$0xff]  }
 0x7fb   : > { %2959 = vrot.lane.b32.xlu1 %v2958_v2, %s3076_s16  ;;  %v2976_v2 = vld [vmem:[%s3218_s21 + $0x10] sm:$0xff]  }
 0x7fc   : > { %v2168_v4 = vpop.f32.mrb[18].mxu0 }
 0x7fd   : > { %v2963_v5 = vpack.i.bf16 %v2168_v4, %v1488_v57  ;;  %v2889_v6 = vpop.f32.mrb[19].mxu0  ;;  %v2735_v4 = vld [vmem:[%s639_s6] ss:$0 sm:$0xff] }
 0x7ff   : > { %2964 = vrot.lane.b32.xlu0 %v2963_v5, %s3077_s26 }
 0x869   : > { %v2955_v7 = vpop.permute.xlu0 %2954 }
 0x86a   : > { %v2957_v9 = vunpack.i.h.bf16 %v2955_v7  ;;  %v2956_v10 = vunpack.i.l.bf16 %v2955_v7 }
 0x86c   : > { %v2184_v15 = vsel %vm835_vm3, %v1673_v60, %v2957_v9  ;;  %v1504_v16 = vsel %vm835_vm3, %v3363_v13, %v2956_v10  ;;  %v2734_v60 = vld [vmem:[%s3561_s17] ss:$0 sm:$0xff] }
 0x86d   : > { %v2960_v8 = vpop.permute.xlu1 %2959 }
 0x86e   : > { %v2962_v11 = vunpack.i.h.bf16 %v2960_v8  ;;  %v2961_v12 = vunpack.i.l.bf16 %v2960_v8 }
 0x870   : > { %v2185_v19 = vsel %vm1505_vm4, %v2184_v15, %v2962_v11  ;;  %v1506_v20 = vsel %vm1505_vm4, %v1504_v16, %v2961_v12 }
 0x871   : > { %v2965_v14 = vpop.permute.xlu0 %2964 }
 0x872   : > { %v2967_v17 = vunpack.i.h.bf16 %v2965_v14  ;;  %v2966_v18 = vunpack.i.l.bf16 %v2965_v14 }
 0x874   : > { %v2186_v21 = vsel %vm1507_vm5, %v2185_v19, %v2967_v17  ;;  %v1508_v22 = vsel %vm1507_vm5, %v1506_v20, %v2966_v18 }
 0x875   : > { %v2187_v23 = vpack.c.bf16 %v2186_v21, %v1508_v22  ;;  %v2739_v22 = vld [vmem:[%s647_s25] ss:$0 sm:$0xff] }
 0x877   : > { %2895 = vmatmul.mubr.msk.bf16.vlgmr.msra.gmra.mrb[16].mxu1 %vm782_vm2, %v2187_v23 }
 0x878   : > { %2914 = vmatprep.mubr.msk.bf16.mxu1 %vm3063_vm1, %v3062_v33  ;;  %2907 = vmatpush3.bf16.msra.mxu1 %v2974_v0 }
 0x879   : > { %2908 = vmatprep.subr.bf16.mxu1 %v3062_v33 }
 0x87c   : > { %2909 = vmatpush3.bf16.msra.mxu1 %v2975_v1 }
 0x87d   : > { %2910 = vmatprep.subr.bf16.mxu1 %v3062_v33 }
 0x880   : > { %2911 = vmatpush3.bf16.msra.mxu1 %v2976_v2 }
 0x881   : > { %2912 = vmatprep.subr.bf16.mxu1 %v3062_v33 }
 0x884   : > { %2913 = vmatpush3.bf16.msra.mxu1 %v2977_v3 }
 0x94a   : > { %v2248_v25 = vpop.f32.mrb[16].mxu1 }
 0x94b   : > { %v2249_v26 = vadd.f32 %v2729_v24, %v2248_v25  ;;  %v2896_v13 = vpop.f32.mrb[17].mxu1 }
 0x94c   : > { %v2251_v27 = vpop.f32.mrb[18].mxu1 }
 0x94d   : > { %v2252_v28 = vadd.f32 %v2729_v24, %v2251_v27  ;;  %v2897_v29 = vpop.f32.mrb[19].mxu1  ;;  %v2255_v43 = vadd.f32 %v2249_v26, %v3257_v35 }
 0x94f   : > { %v2259_v30 = vsel %vm782_vm2, %v2255_v43, 0.0  ;;  %v2256_v31 = vadd.f32 %v2252_v28, %v3259_v36  ;;  %v2972_v36 = vld [vmem:[%s3208_s4] sm:$0xff]  }
 0x950   : > { %2260 = vadd.xlane.f32.xlu1 %v2259_v30  ;;  %2899 = vmatpush3.bf16.msra.mxu0 %v2972_v36 }
 0x951   : > { %v2262_v32 = vsel %vm782_vm2, %v2256_v31, 0.0  ;;  %2900 = vmatprep.subr.bf16.mxu0 %v3062_v33 }
 0x952   : > { %2263 = vadd.xlane.f32.xlu0 %v2262_v32 }
 0x954   : > { %2901 = vmatpush3.bf16.msra.mxu0 %v2973_v47 }
 0x9dd   : > { %v2261_v34 = vpop.xlane.xlu1 %2260 }
 0x9de   : > { %v2266_v37 = vmul.f32 0.03125, %v2261_v34 }
 0x9df   : > { %v2264_v38 = vpop.xlane.xlu0 %2263 }
 0x9e0   : > { %v2268_v39 = vsub.f32 %v2255_v43, %v2266_v37  ;;  %v2267_v41 = vmul.f32 0.03125, %v2264_v38 }
 0x9e2   : > { %v2269_v42 = vsub.f32 %v2256_v31, %v2267_v41  ;;  %v2270_v44 = vmul.f32 %v2268_v39, %v2268_v39 }
 0x9e4   : > { %v2272_v45 = vsel %vm782_vm2, %v2270_v44, 0.0  ;;  %v2271_v35 = vmul.f32 %v2269_v42, %v2269_v42 }
 0x9e5   : > { %2273 = vadd.xlane.f32.xlu0 %v2272_v45 }
 0x9e6   : > { %v2275_v46 = vsel %vm782_vm2, %v2271_v35, 0.0 }
 0x9e7   : > { %2276 = vadd.xlane.f32.xlu1 %v2275_v46 }
 0xa72   : > { %v2274_v48 = vpop.xlane.xlu0 %2273 }
 0xa73   : > { %v2278_v49 = vmul.f32 0.03125, %v2274_v48 }
 0xa74   : > { %v2277_v50 = vpop.xlane.xlu1 %2276 }
 0xa75   : > { %v2280_v51 = vadd.f32 1e-12, %v2278_v49  ;;  %v2279_v52 = vmul.f32 0.03125, %v2277_v50 }
 0xa77   : > { %3010 = vrsqrt.f32 %v2280_v51  ;;  %v2281_v53 = vadd.f32 1e-12, %v2279_v52  ;;  %v2745_v51 = vld [vmem:[%s650_s28] ss:$0 sm:$0xff] }
 0xa79   : > { %3012 = vrsqrt.f32 %v2281_v53 }
 0xa81   : > { %v3011_v54 = vpop.eup %3010 }
 0xa82   : > { %v2284_v56 = vmul.f32 %v3011_v54, %v2268_v39  ;;  %v2746_v54 = vld [vmem:[%s653_s3] ss:$0 sm:$0xff] }
 0xa83   : > { %v3013_v57 = vpop.eup %3012 }
 0xa84   : > { %v2292_v58 = vmul.f32 %v2733_v55, %v2284_v56  ;;  %v2285_v59 = vmul.f32 %v3013_v57, %v2269_v42 }
 0xa86   : > { %v2293_v61 = vmul.f32 %v2733_v55, %v2285_v59  ;;  %v2300_v62 = vadd.f32 %v2734_v60, %v2292_v58 }
 0xa88   : > { %v2301_v40 = vadd.f32 %v2734_v60, %v2293_v61 }
 0xa8a   : > { %v2302_v63 = vpack.c.bf16 %v2301_v40, %v2300_v62 }
 0xa8c   : > { %2903 = vmatmul.mubr.msk.bf16.vlgmr.msra.gmra.mrb[20].mxu0 %vm782_vm2, %v2302_v63 }
 0xb5f   : > { %v2363_v5 = vpop.f32.mrb[20].mxu0 }
 0xb60   : > { %v2364_v6 = vadd.f32 %v2735_v4, %v2363_v5  ;;  %v2904_v7 = vpop.f32.mrb[21].mxu0 }
 0xb61   : > { %v2366_v8 = vpop.f32.mrb[22].mxu0 }
 0xb62   : > { %v2372_v9 = vmul.f32 0.70710677, %v2364_v6  ;;  %v2367_v10 = vadd.f32 %v2735_v4, %v2366_v8  ;;  %v2905_v11 = vpop.f32.mrb[23].mxu0  ;;  %v2370_v16 = vmul.f32 0.5, %v2364_v6 }
 0xb64   : > { %3014 = verf.f32 %v2372_v9  ;;  %v2373_v12 = vmul.f32 0.70710677, %v2367_v10  ;;  %v2371_v17 = vmul.f32 0.5, %v2367_v10 }
 0xb66   : > { %3016 = verf.f32 %v2373_v12 }
 0xb6e   : > { %v3015_v14 = vpop.eup %3014 }
 0xb6f   : > { %v2376_v33 = vadd.f32 1.0, %v3015_v14 }
 0xb70   : > { %v3017_v15 = vpop.eup %3016 }
 0xb71   : > { %v2377_v18 = vadd.f32 1.0, %v3017_v15  ;;  %v2378_v19 = vmul.f32 %v2376_v33, %v2370_v16 }
 0xb73   : > { %v2379_v20 = vmul.f32 %v2377_v18, %v2371_v17 }
 0xb75   : > { %v2380_v21 = vpack.c.bf16 %v2379_v20, %v2378_v19 }
 0xb77   : > { %2915 = vmatmul.mubr.msk.bf16.vlgmr.msra.gmra.mrb[20].mxu1 %vm2420_vm6, %v2380_v21 }
 0xc4a   : > { %v2458_v23 = vpop.f32.mrb[20].mxu1 }
 0xc4b   : > { %v2459_v24 = vadd.f32 %v2739_v22, %v2458_v23  ;;  %v2916_v25 = vpop.f32.mrb[21].mxu1 }
 0xc4c   : > { %v2461_v26 = vpop.f32.mrb[22].mxu1 }
 0xc4d   : > { %v2462_v13 = vadd.f32 %v2739_v22, %v2461_v26  ;;  %v2917_v27 = vpop.f32.mrb[23].mxu1  ;;  %v2465_v28 = vadd.f32 %v2459_v24, %v2300_v62 }
 0xc4f   : > { %v2469_v29 = vsel %vm782_vm2, %v2465_v28, 0.0  ;;  %v2466_v43 = vadd.f32 %v2462_v13, %v2301_v40 }
 0xc50   : > { %2470 = vadd.xlane.f32.xlu0 %v2469_v29 }
 0xc51   : > { %v2472_v30 = vsel %vm782_vm2, %v2466_v43, 0.0 }
 0xc52   : > { %2473 = vadd.xlane.f32.xlu1 %v2472_v30 }
 0xcdd   : > { %v2471_v31 = vpop.xlane.xlu0 %2470 }
 0xcde   : > { %v2475_v32 = vmul.f32 0.03125, %v2471_v31 }
 0xcdf   : > { %v2474_v34 = vpop.xlane.xlu1 %2473 }
 0xce0   : > { %v2477_v37 = vsub.f32 %v2465_v28, %v2475_v32  ;;  %v2476_v38 = vmul.f32 0.03125, %v2474_v34 }
 0xce2   : > { %v2478_v39 = vsub.f32 %v2466_v43, %v2476_v38  ;;  %v2479_v41 = vmul.f32 %v2477_v37, %v2477_v37 }
 0xce4   : > { %v2481_v42 = vsel %vm782_vm2, %v2479_v41, 0.0  ;;  %v2480_v44 = vmul.f32 %v2478_v39, %v2478_v39 }
 0xce5   : > { %2482 = vadd.xlane.f32.xlu0 %v2481_v42 }
 0xce6   : > { %v2484_v45 = vsel %vm782_vm2, %v2480_v44, 0.0 }
 0xce7   : > { %2485 = vadd.xlane.f32.xlu1 %v2484_v45 }
 0xd72   : > { %v2483_v35 = vpop.xlane.xlu0 %2482 }
 0xd73   : > { %v2487_v46 = vmul.f32 0.03125, %v2483_v35 }
 0xd74   : > { %v2486_v36 = vpop.xlane.xlu1 %2485 }
 0xd75   : > { %v2489_v47 = vadd.f32 1e-12, %v2487_v46  ;;  %v2488_v48 = vmul.f32 0.03125, %v2486_v36 }
 0xd77   : > { %3018 = vrsqrt.f32 %v2489_v47  ;;  %v2490_v49 = vadd.f32 1e-12, %v2488_v48 }
 0xd79   : > { %3020 = vrsqrt.f32 %v2490_v49 }
 0xd81   : > { %v3019_v50 = vpop.eup %3018 }
 0xd82   : > { %v2493_v52 = vmul.f32 %v3019_v50, %v2477_v37 }
 0xd83   : > { %v3021_v53 = vpop.eup %3020 }
 0xd84   : > { %v2501_v55 = vmul.f32 %v2745_v51, %v2493_v52  ;;  %v2494_v56 = vmul.f32 %v3021_v53, %v2478_v39  ;;  %2516 = sbr.rel (%p2747_p5) target bundleno = 3470 (0xd8e), region = 123 }
 0xd86   : > { %v2509_v57 = vadd.f32 %v2746_v54, %v2501_v55  ;;  %v2502_v58 = vmul.f32 %v2745_v51, %v2494_v56 }
 0xd88   : > { %2511 = vst.msk [vmem:[#allocation2] sm:$0xff] %vm782_vm2, %v2509_v57  ;;  %v2510_v59 = vadd.f32 %v2746_v54, %v2502_v58 }
 0xd8a   : > { %2512 = vst.msk [vmem:[#allocation2 + $0x8] sm:$0xff] %vm782_vm2, %v2510_v59  ;;  %v2518_v60 = vrot.slane (!%p2747_p5), %v2510_v59, 7 }
 0xd8c   : > { %v2521_v61 = vsel %vm2520_vm7, %v2509_v57, %v2518_v60 }
 0xd8d   : > { %2523 = vst.msk [vmem:[#allocation3] sm:$0x3] %vm2522_vm8, %v2521_v61 }
 0xd8e PF: > { %p2922_p6 = scmp.eq.s32.totalorder %s3170_s22, 1  ;;  %s3078_s3 = smov [#allocation3]  }
 0xd8f   : > { %s2531_s23 = sshll.u32 %s3078_s3, 4  ;;  %s2532_s23 = int_to_ptr.vmem [resolvable:$true] %s2531_s23 }
 0xd90   : > { %s3022_s28 = scalar_lea.vmem %s2532_s23, 32  ;;  %p3029_p10 = scmp.lt.s32.totalorder %s2532_s23, %s2532_s23 }
 0xd91   : > { %p3023_p7 = scmp.ne.s32.totalorder %s2532_s23, %s3022_s28  ;;  %p3030_p11 = scmp.lt.s32.totalorder %s3022_s28, %s3022_s28 }
 0xd93   : > { %p3024_p8 = pnand %p3023_p7, %p2922_p6  ;;  %p3031_p12 = por %p3030_p11, %p3029_p10 }
 0xd95   : > { %p3025_p9 = pneg %p3024_p8 }
 0xd97   : > { %p3032_p13 = pnand %p3031_p12, %p3025_p9 }
 0xd99   : > { %3035 = shalt.err (!%p3032_p13)
}
 0xd9a   : > { %s3562_s18 = sld [smem:[#allocation16_spill]] }
 0xda0   : > { %s3036_s20 = scalar_lea.hbm %s3562_s18, 32 }
 0xda1   : > { %p3037_p0 = scmp.ne.s32.totalorder %s3562_s18, %s3036_s20  ;;  %p3042_p3 = scmp.lt.u32.totalorder %s3036_s20, %s3562_s18 }
 0xda3   : > { %p3038_p1 = pnand %p3037_p0, %p2922_p6 }
 0xda5   : > { %p3039_p2 = pneg %p3038_p1 }
 0xda7   : > { %p3044_p4 = pnand %p3042_p3, %p3039_p2 }
 0xda9   : > { %3047 = shalt.err (!%p3044_p4)
}
 0xdaa   : > { %2919 = dma.vmem_to_hbm [thread:$0]  (%p2922_p6), %s2532_s23, 32, %s3562_s18, [#allocation4]  }
 0xdab   : > { %3055 = dma.done.wait (%p2922_p6), [#allocation4], 32  }
 0xdac   : > { %3057 = vsyncadd (%p2922_p6), [#allocation4], 4294967264 }
 0xdad PF: > { %s3563_s21 = sld [smem:[#allocation9_spill]] }
 0xdb3   : > { %s27_s21 = sadd.s32 1, %s3563_s21  }
 0xdb4   : > { %p24_p5 = scmp.ge.s32.totalorder %s27_s21, 4  }
 0xdb6   :  { %26 = sbr.rel (!%p24_p5) target bundleno = 8 (0x8), region = 191 }
 0xdbd   :  { %2544 = vsyncpa [#allocation4], 1 }
 0xdbe   :  { %2546 = vsyncpa [#allocation4 + $0x1], 1 }

</bundles_post_ra>
